<compile_context>
chip_gen: v5e
topology: v5e:2x2
jax: 0.10.0
libtpu: 0.0.40
codegen_flags: <defaults>
</compile_context>

<pallas_src>
import math

import jax
import jax.numpy as jnp
import numpy as np
from jax.experimental import pallas as pl
from jax.experimental.pallas import tpu as pltpu

# ---- model hyper-parameters (small, consistent with the module) -------------
INPUT_SIZE = 16
HIDDEN = 32
NUM_LAYERS = 2
NUM_CLASSES = 5
NHEAD = 8
HEAD_DIM = HIDDEN // NHEAD
FFN = HIDDEN * 2
LN_EPS = 1e-5  # PyTorch LayerNorm default

# vecs-slab row indices (per layer): bqkv, b1, bo, ln1_g, ln1_b, b2, ln2_g, ln2_b
N_VEC_ROWS = 8


# =============================== kernel ======================================

def _layer_norm(x, g, b):
    mu = jnp.mean(x, axis=-1, keepdims=True)
    var = jnp.mean((x - mu) ** 2, axis=-1, keepdims=True)
    return (x - mu) * jax.lax.rsqrt(var + LN_EPS) * g + b


def _fused_forward_kernel(x_ref, neg_ref, emb_ref, wqkv_ref, wow1_ref, w2_ref,
                          vec_ref, fc_ref, o_ref):
    """Entire Transformer forward for the whole batch in one kernel invocation."""
    B = o_ref.shape[0]
    S = x_ref.shape[0] // B
    BS = B * S
    f32 = jnp.float32

    # ---- loop-invariant selector matrices (built on the VPU, zero DMA) -------
    # m_sum[c, h] = 1 iff channel c belongs to head h              (H, NHEAD)
    c_i = jax.lax.broadcasted_iota(jnp.int32, (HIDDEN, NHEAD), 0)
    h_i = jax.lax.broadcasted_iota(jnp.int32, (HIDDEN, NHEAD), 1) * HEAD_DIM
    m_sum = ((c_i >= h_i) & (c_i < h_i + HEAD_DIM)).astype(f32)
    # m_exp = m_sum^T                                              (NHEAD, H)
    c_j = jax.lax.broadcasted_iota(jnp.int32, (NHEAD, HIDDEN), 1)
    h_j = jax.lax.broadcasted_iota(jnp.int32, (NHEAD, HIDDEN), 0) * HEAD_DIM
    m_exp = ((c_j >= h_j) & (c_j < h_j + HEAD_DIM)).astype(f32)
    # row_sel[r, f] = 1 iff flat score row f=(b,i,j) has (b,i)==r  (BS, BS*S)
    r_i = jax.lax.broadcasted_iota(jnp.int32, (BS, BS * S), 0) * S
    f_i = jax.lax.broadcasted_iota(jnp.int32, (BS, BS * S), 1)
    row_sel = ((f_i >= r_i) & (f_i < r_i + S)).astype(f32)

    # ---- embedding (bias folded via the ones column appended to x) -----------
    h = jnp.dot(x_ref[...], emb_ref[...], preferred_element_type=f32)      # (BS, H)

    neg = neg_ref[...]                                  # (BS*S, 1): -1e30 at padded keys

    for l in range(NUM_LAYERS):                         # static unroll over layers
        vec = vec_ref[l]                                # (8, 3H) bias/LN slab
        wow1 = wow1_ref[l]                              # (H, H + FFN) = [wo | w1]

        # --- multi-head self attention (packed QKV; scale folded into Q) ------
        qkv = jnp.dot(h, wqkv_ref[l], preferred_element_type=f32) + vec[0:1, :]
        q = qkv[:, :HIDDEN].reshape(B, S, HIDDEN)
        k = qkv[:, HIDDEN:2 * HIDDEN].reshape(B, S, HIDDEN)
        v = qkv[:, 2 * HIDDEN:].reshape(B, S, HIDDEN)

        # per-channel outer product over (query, key): rows flat-indexed by (b,i,j)
        prod = (q[:, :, None, :] * k[:, None, :, :]).reshape(BS * S, HIDDEN)
        s = jnp.dot(prod, m_sum, preferred_element_type=f32)               # (BS*S, NHEAD)
        # additive key-padding mask; max-subtraction dropped (scores are tiny & bounded;
        # exp(-1e30) underflows cleanly to 0).  A fully-padded sequence would yield a
        # zero denominator here (PyTorch would yield NaNs) - that case does not occur.
        p = jnp.exp(s + neg)                                               # (BS*S, NHEAD)
        pe = jnp.dot(p, m_exp, preferred_element_type=f32)                 # (BS*S, H)
        v_rep = jnp.broadcast_to(v[:, None, :, :],
                                 (B, S, S, HIDDEN)).reshape(BS * S, HIDDEN)
        num = jnp.dot(row_sel, pe * v_rep, preferred_element_type=f32)     # (BS, H)
        den = jnp.dot(row_sel, pe, preferred_element_type=f32)             # (BS, H)
        attn = num * pl.reciprocal(den, approx=True)

        attn = (jnp.dot(attn, wow1[:, :HIDDEN], preferred_element_type=f32)
                + vec[2:3, :HIDDEN])

        # residual + LayerNorm 1 (post-norm; dropout = identity in eval)
        h = _layer_norm(h + attn, vec[3:4, :HIDDEN], vec[4:5, :HIDDEN])

        # --- feed-forward: Linear -> ReLU -> Linear ----------------------------
        f = jnp.dot(h, wow1[:, HIDDEN:], preferred_element_type=f32) + vec[1:2, :FFN]
        f = jnp.maximum(f, 0.0)
        f = jnp.dot(f, w2_ref[l], preferred_element_type=f32) + vec[5:6, :HIDDEN]

        # residual + LayerNorm 2
        h = _layer_norm(h + f, vec[6:7, :HIDDEN], vec[7:8, :HIDDEN])

    # ---- mean over sequence + classifier head --------------------------------
    pooled = jnp.mean(h.reshape(B, S, HIDDEN), axis=1)                     # (B, H)
    # TODO(synk): nn.Dropout after pooling is identity in eval mode; training-mode
    # stochastic dropout is not implemented.
    o_ref[...] = (jnp.dot(pooled, fc_ref[:HIDDEN, :], preferred_element_type=f32)
                  + fc_ref[HIDDEN:, :])


# ============================= parameter packing ==============================

def prepare_params(params):
    """One-time host-side packing: stack per-layer weights on a leading L axis,
    concatenate QKV / [wo|w1], fold the 1/sqrt(head_dim) scale into Q, fold the
    embedding bias into a padded embedding weight, and pack all small bias/LN
    vectors into one (L, 8, 3H) slab."""
    layers = params["layers"]
    scale = 1.0 / math.sqrt(HEAD_DIM)

    def stack(name):
        return jnp.stack([lp[name] for lp in layers])                      # (L, ...)

    wqkv = jnp.concatenate([stack("wq") * scale, stack("wk"), stack("wv")], axis=-1)
    wow1 = jnp.concatenate([stack("wo"), stack("w1")], axis=-1)             # (L,H,H+FFN)
    w2 = stack("w2")                                                        # (L,FFN,H)

    bqkv = jnp.concatenate([stack("bq") * scale, stack("bk"), stack("bv")], axis=-1)

    def pad_row(v):                                     # (L,1,w) -> (L,1,3H)
        return jnp.pad(v, ((0, 0), (0, 0), (0, 3 * HIDDEN - v.shape[-1])))

    vecs = jnp.concatenate([
        bqkv,                       # row 0: packed QKV bias (3H)
        pad_row(stack("b1")),       # row 1: FFN bias 1 (FFN wide)
        pad_row(stack("bo")),       # row 2: attention out-proj bias
        pad_row(stack("ln1_g")),    # row 3
        pad_row(stack("ln1_b")),    # row 4
        pad_row(stack("b2")),       # row 5: FFN bias 2
        pad_row(stack("ln2_g")),    # row 6
        pad_row(stack("ln2_b")),    # row 7
    ], axis=1)                                                              # (L,8,3H)

    # embedding with bias folded in; contraction dim padded to a multiple of 8
    kp = ((INPUT_SIZE + 1 + 7) // 8) * 8
    emb = jnp.zeros((kp, HIDDEN), jnp.float32)
    emb = emb.at[:INPUT_SIZE].set(params["emb_w"])
    emb = emb.at[INPUT_SIZE].set(params["emb_b"][0])

    fc = jnp.concatenate([params["fc_w"], params["fc_b"]], axis=0)          # (H+1, NC)

    return {"emb": emb, "wqkv": wqkv, "wow1": wow1, "w2": w2,
            "vecs": vecs, "fc": fc}


# ================================ wrapper =====================================

def transformer_forward(prep, x, attention_mask):
    """x: (B, S, INPUT_SIZE) f32, attention_mask: (B, S) f32 (1.0 = valid token)."""
    B, S, _ = x.shape
    kp = prep["emb"].shape[0]

    x2 = x.reshape(B * S, INPUT_SIZE)
    x_aug = jnp.concatenate(
        [x2,
         jnp.ones((B * S, 1), jnp.float32),
         jnp.zeros((B * S, kp - INPUT_SIZE - 1), jnp.float32)], axis=-1)    # (BS, kp)

    # `~attention_mask.bool()` in PyTorch -> -1e30 additive bias at padded KEY positions,
    # replicated over the query index so it lines up with the flat (b, i, j) score rows.
    neg = (1.0 - attention_mask).astype(jnp.float32) * (-1e30)              # (B, S)
    neg_flat = jnp.broadcast_to(neg[:, None, :], (B, S, S)).reshape(B * S * S, 1)

    def full(a):
        n = a.ndim
        return pl.BlockSpec(a.shape, lambda i: (0,) * n)

    args = (x_aug, neg_flat, prep["emb"], prep["wqkv"], prep["wow1"],
            prep["w2"], prep["vecs"], prep["fc"])

    return pl.pallas_call(
        _fused_forward_kernel,
        out_shape=jax.ShapeDtypeStruct((B, NUM_CLASSES), jnp.float32),
        grid=(1,),
        in_specs=[full(a) for a in args],
        out_specs=pl.BlockSpec((B, NUM_CLASSES), lambda i: (0, 0)),
        compiler_params=pltpu.CompilerParams(dimension_semantics=("arbitrary",)),
    )(*args)


# ===================== deterministic parameter init ==========================

def init_params(key):
    def nrm(k, shape, scale=0.05):
        return scale * jax.random.normal(k, shape, dtype=jnp.float32)

    keys = iter(jax.random.split(key, 128))
    p = {
        "emb_w": nrm(next(keys), (INPUT_SIZE, HIDDEN)),
        "emb_b": nrm(next(keys), (1, HIDDEN)),
        "layers": [],
        "fc_w": nrm(next(keys), (HIDDEN, NUM_CLASSES)),
        "fc_b": nrm(next(keys), (1, NUM_CLASSES)),
    }
    for _ in range(NUM_LAYERS):
        lp = dict(
            wq=nrm(next(keys), (HIDDEN, HIDDEN)), bq=nrm(next(keys), (1, HIDDEN)),
            wk=nrm(next(keys), (HIDDEN, HIDDEN)), bk=nrm(next(keys), (1, HIDDEN)),
            wv=nrm(next(keys), (HIDDEN, HIDDEN)), bv=nrm(next(keys), (1, HIDDEN)),
            wo=nrm(next(keys), (HIDDEN, HIDDEN)), bo=nrm(next(keys), (1, HIDDEN)),
            ln1_g=jnp.ones((1, HIDDEN), jnp.float32),
            ln1_b=jnp.zeros((1, HIDDEN), jnp.float32),
            w1=nrm(next(keys), (HIDDEN, FFN)), b1=nrm(next(keys), (1, FFN)),
            w2=nrm(next(keys), (FFN, HIDDEN)), b2=nrm(next(keys), (1, HIDDEN)),
            ln2_g=jnp.ones((1, HIDDEN), jnp.float32),
            ln2_b=jnp.zeros((1, HIDDEN), jnp.float32),
        )
        p["layers"].append(lp)
    return p


# ======================= pure-JAX reference (sanity) ==========================

def _ln_ref(x, g, b):
    mu = x.mean(-1, keepdims=True)
    var = ((x - mu) ** 2).mean(-1, keepdims=True)
    return (x - mu) / jnp.sqrt(var + LN_EPS) * g + b


def reference_forward(params, x, attention_mask):
    B, S, _ = x.shape
    h = x @ params["emb_w"] + params["emb_b"]
    pad = attention_mask < 0.5                      # True = padded key
    for lp in params["layers"]:
        q = h @ lp["wq"] + lp["bq"]
        k = h @ lp["wk"] + lp["bk"]
        v = h @ lp["wv"] + lp["bv"]
        qh = q.reshape(B, S, NHEAD, HEAD_DIM)
        kh = k.reshape(B, S, NHEAD, HEAD_DIM)
        vh = v.reshape(B, S, NHEAD, HEAD_DIM)
        s = jnp.einsum("bqhd,bkhd->bhqk", qh, kh) / (HEAD_DIM ** 0.5)
        s = jnp.where(pad[:, None, None, :], -1e30, s)
        p = jax.nn.softmax(s, axis=-1)
        a = jnp.einsum("bhqk,bkhd->bqhd", p, vh).reshape(B, S, HIDDEN)
        a = a @ lp["wo"] + lp["bo"]
        h = _ln_ref(h + a, lp["ln1_g"], lp["ln1_b"])
        f = jnp.maximum(h @ lp["w1"] + lp["b1"], 0.0) @ lp["w2"] + lp["b2"]
        h = _ln_ref(h + f, lp["ln2_g"], lp["ln2_b"])
    pooled = h.mean(axis=1)
    return pooled @ params["fc_w"] + params["fc_b"]


# ================================ main ========================================

if __name__ == "__main__":
    key = jax.random.PRNGKey(0)
    k_x, k_p = jax.random.split(key)

    B, S = 2, 8
    x = jax.random.normal(k_x, (B, S, INPUT_SIZE), dtype=jnp.float32)
    # attention_mask: 1.0 = valid token, 0.0 = padding (as produced by collate())
    lengths = jnp.array([S, 5])
    attention_mask = (jnp.arange(S)[None, :] < lengths[:, None]).astype(jnp.float32)

    params = init_params(k_p)
    prep = prepare_params(params)          # one-time packing + scale/bias folding

    out = transformer_forward(prep, x, attention_mask)
    out = jax.block_until_ready(out)

    ref = reference_forward(params, x, attention_mask)
    np.testing.assert_allclose(np.asarray(out), np.asarray(ref),
                               rtol=1e-2, atol=1e-2)
    assert out.shape == (B, NUM_CLASSES)
    print("KERNEL_OK")
</pallas_src>

<mosaic_0001>
module attributes {stable_mosaic.version = 11 : i64} {
  func.func @_fused_forward_kernel(%arg0: i32, %arg1: memref<16x24xf32, #tpu.memory_space<vmem>>, %arg2: memref<128x1xf32, #tpu.memory_space<vmem>>, %arg3: memref<24x32xf32, #tpu.memory_space<vmem>>, %arg4: memref<2x32x96xf32, #tpu.memory_space<vmem>>, %arg5: memref<2x32x96xf32, #tpu.memory_space<vmem>>, %arg6: memref<2x64x32xf32, #tpu.memory_space<vmem>>, %arg7: memref<2x8x96xf32, #tpu.memory_space<vmem>>, %arg8: memref<33x5xf32, #tpu.memory_space<vmem>>, %arg9: memref<2x5xf32, #tpu.memory_space<vmem>>) attributes {dimension_semantics = [#tpu.dimension_semantics<arbitrary>], iteration_bounds = array<i64: 1>, scalar_prefetch = 0 : i64, scratch_operands = 0 : i64, tpu.core_type = #tpu.core_type<tc>, window_params = [{pipeline_mode = #tpu.pipeline_mode<synchronous>, transform_indices = @transform_0, window_bounds = array<i64: 16, 24>}, {pipeline_mode = #tpu.pipeline_mode<synchronous>, transform_indices = @transform_1, window_bounds = array<i64: 128, 1>}, {pipeline_mode = #tpu.pipeline_mode<synchronous>, transform_indices = @transform_2, window_bounds = array<i64: 24, 32>}, {pipeline_mode = #tpu.pipeline_mode<synchronous>, transform_indices = @transform_3, window_bounds = array<i64: 2, 32, 96>}, {pipeline_mode = #tpu.pipeline_mode<synchronous>, transform_indices = @transform_4, window_bounds = array<i64: 2, 32, 96>}, {pipeline_mode = #tpu.pipeline_mode<synchronous>, transform_indices = @transform_5, window_bounds = array<i64: 2, 64, 32>}, {pipeline_mode = #tpu.pipeline_mode<synchronous>, transform_indices = @transform_6, window_bounds = array<i64: 2, 8, 96>}, {pipeline_mode = #tpu.pipeline_mode<synchronous>, transform_indices = @transform_7, window_bounds = array<i64: 33, 5>}, {pipeline_mode = #tpu.pipeline_mode<synchronous>, transform_indices = @transform_8, window_bounds = array<i64: 2, 5>}]} {
    %0 = tpu.iota {dimensions = array<i32: 0>} : vector<32x8xi32>
    %1 = tpu.iota {dimensions = array<i32: 1>} : vector<32x8xi32>
    %c4_i32 = arith.constant 4 : i32
    %2 = vector.broadcast %c4_i32 : i32 to vector<32x8xi32>
    %3 = arith.muli %1, %2 : vector<32x8xi32>
    %4 = arith.cmpi sge, %0, %3 : vector<32x8xi32>
    %c4_i32_0 = arith.constant 4 : i32
    %5 = vector.broadcast %c4_i32_0 : i32 to vector<32x8xi32>
    %6 = arith.addi %3, %5 : vector<32x8xi32>
    %7 = arith.cmpi slt, %0, %6 : vector<32x8xi32>
    %8 = arith.andi %4, %7 : vector<32x8xi1>
    %9 = arith.extui %8 : vector<32x8xi1> to vector<32x8xi32>
    %10 = arith.sitofp %9 : vector<32x8xi32> to vector<32x8xf32>
    %11 = tpu.iota {dimensions = array<i32: 1>} : vector<8x32xi32>
    %12 = tpu.iota {dimensions = array<i32: 0>} : vector<8x32xi32>
    %c4_i32_1 = arith.constant 4 : i32
    %13 = vector.broadcast %c4_i32_1 : i32 to vector<8x32xi32>
    %14 = arith.muli %12, %13 : vector<8x32xi32>
    %15 = arith.cmpi sge, %11, %14 : vector<8x32xi32>
    %c4_i32_2 = arith.constant 4 : i32
    %16 = vector.broadcast %c4_i32_2 : i32 to vector<8x32xi32>
    %17 = arith.addi %14, %16 : vector<8x32xi32>
    %18 = arith.cmpi slt, %11, %17 : vector<8x32xi32>
    %19 = arith.andi %15, %18 : vector<8x32xi1>
    %20 = arith.extui %19 : vector<8x32xi1> to vector<8x32xi32>
    %21 = arith.sitofp %20 : vector<8x32xi32> to vector<8x32xf32>
    %22 = tpu.iota {dimensions = array<i32: 0>} : vector<16x128xi32>
    %c8_i32 = arith.constant 8 : i32
    %23 = vector.broadcast %c8_i32 : i32 to vector<16x128xi32>
    %24 = arith.muli %22, %23 : vector<16x128xi32>
    %25 = tpu.iota {dimensions = array<i32: 1>} : vector<16x128xi32>
    %26 = arith.cmpi sge, %25, %24 : vector<16x128xi32>
    %c8_i32_3 = arith.constant 8 : i32
    %27 = vector.broadcast %c8_i32_3 : i32 to vector<16x128xi32>
    %28 = arith.addi %24, %27 : vector<16x128xi32>
    %29 = arith.cmpi slt, %25, %28 : vector<16x128xi32>
    %30 = arith.andi %26, %29 : vector<16x128xi1>
    %31 = arith.extui %30 : vector<16x128xi1> to vector<16x128xi32>
    %32 = arith.sitofp %31 : vector<16x128xi32> to vector<16x128xf32>
    %c0 = arith.constant 0 : index
    %c0_4 = arith.constant 0 : index
    %33 = vector.load %arg1[%c0, %c0_4] : memref<16x24xf32, #tpu.memory_space<vmem>>, vector<16x24xf32>
    %c0_5 = arith.constant 0 : index
    %c0_6 = arith.constant 0 : index
    %34 = vector.load %arg3[%c0_5, %c0_6] : memref<24x32xf32, #tpu.memory_space<vmem>>, vector<24x32xf32>
    %cst = arith.constant dense<0.000000e+00> : vector<16x32xf32>
    %35 = tpu.matmul %33, %34, %cst {dimension_numbers = #tpu.dot_dimension_numbers<[1], [0], [0], [1], [0, 0, 1, 1], [], []>} : vector<16x24xf32>, vector<24x32xf32>, vector<16x32xf32> -> vector<16x32xf32>
    %c0_7 = arith.constant 0 : index
    %c0_8 = arith.constant 0 : index
    %36 = vector.load %arg2[%c0_7, %c0_8] : memref<128x1xf32, #tpu.memory_space<vmem>>, vector<128x1xf32>
    %c0_9 = arith.constant 0 : index
    %c0_10 = arith.constant 0 : index
    %c0_11 = arith.constant 0 : index
    %37 = vector.load %arg7[%c0_9, %c0_10, %c0_11] : memref<2x8x96xf32, #tpu.memory_space<vmem>>, vector<1x8x96xf32>
    %38 = vector.shape_cast %37 : vector<1x8x96xf32> to vector<8x96xf32>
    %c0_12 = arith.constant 0 : index
    %c0_13 = arith.constant 0 : index
    %c0_14 = arith.constant 0 : index
    %39 = vector.load %arg5[%c0_12, %c0_13, %c0_14] : memref<2x32x96xf32, #tpu.memory_space<vmem>>, vector<1x32x96xf32>
    %40 = vector.shape_cast %39 : vector<1x32x96xf32> to vector<32x96xf32>
    %c0_15 = arith.constant 0 : index
    %c0_16 = arith.constant 0 : index
    %c0_17 = arith.constant 0 : index
    %41 = vector.load %arg4[%c0_15, %c0_16, %c0_17] : memref<2x32x96xf32, #tpu.memory_space<vmem>>, vector<1x32x96xf32>
    %42 = vector.shape_cast %41 : vector<1x32x96xf32> to vector<32x96xf32>
    %cst_18 = arith.constant dense<0.000000e+00> : vector<16x96xf32>
    %43 = tpu.matmul %35, %42, %cst_18 {dimension_numbers = #tpu.dot_dimension_numbers<[1], [0], [0], [1], [0, 0, 1, 1], [], []>} : vector<16x32xf32>, vector<32x96xf32>, vector<16x96xf32> -> vector<16x96xf32>
    %44 = vector.extract_strided_slice %38 {offsets = [0, 0], sizes = [1, 96], strides = [1, 1]} : vector<8x96xf32> to vector<1x96xf32>
    %45 = vector.broadcast %44 : vector<1x96xf32> to vector<16x96xf32>
    %46 = arith.addf %43, %45 : vector<16x96xf32>
    %47 = vector.extract_strided_slice %46 {offsets = [0, 0], sizes = [16, 32], strides = [1, 1]} : vector<16x96xf32> to vector<16x32xf32>
    %48 = vector.shape_cast %47 : vector<16x32xf32> to vector<2x8x32xf32>
    %49 = vector.extract_strided_slice %46 {offsets = [0, 32], sizes = [16, 32], strides = [1, 1]} : vector<16x96xf32> to vector<16x32xf32>
    %50 = vector.shape_cast %49 : vector<16x32xf32> to vector<2x8x32xf32>
    %51 = vector.extract_strided_slice %46 {offsets = [0, 64], sizes = [16, 32], strides = [1, 1]} : vector<16x96xf32> to vector<16x32xf32>
    %52 = vector.shape_cast %51 : vector<16x32xf32> to vector<2x8x32xf32>
    %53 = vector.shape_cast %48 : vector<2x8x32xf32> to vector<2x8x1x32xf32>
    %54 = vector.shape_cast %50 : vector<2x8x32xf32> to vector<2x1x8x32xf32>
    %55 = vector.broadcast %53 : vector<2x8x1x32xf32> to vector<2x8x8x32xf32>
    %56 = vector.broadcast %54 : vector<2x1x8x32xf32> to vector<2x8x8x32xf32>
    %57 = arith.mulf %55, %56 : vector<2x8x8x32xf32>
    %58 = vector.shape_cast %57 : vector<2x8x8x32xf32> to vector<128x32xf32>
    %cst_19 = arith.constant dense<0.000000e+00> : vector<128x8xf32>
    %59 = tpu.matmul %58, %10, %cst_19 {dimension_numbers = #tpu.dot_dimension_numbers<[1], [0], [0], [1], [0, 0, 1, 1], [], []>} : vector<128x32xf32>, vector<32x8xf32>, vector<128x8xf32> -> vector<128x8xf32>
    %60 = vector.broadcast %36 : vector<128x1xf32> to vector<128x8xf32>
    %61 = arith.addf %59, %60 : vector<128x8xf32>
    %62 = math.exp %61 : vector<128x8xf32>
    %cst_20 = arith.constant dense<0.000000e+00> : vector<128x32xf32>
    %63 = tpu.matmul %62, %21, %cst_20 {dimension_numbers = #tpu.dot_dimension_numbers<[1], [0], [0], [1], [0, 0, 1, 1], [], []>} : vector<128x8xf32>, vector<8x32xf32>, vector<128x32xf32> -> vector<128x32xf32>
    %64 = vector.shape_cast %52 : vector<2x8x32xf32> to vector<2x1x8x32xf32>
    %65 = vector.shape_cast %64 : vector<2x1x8x32xf32> to vector<2x1x8x32xf32>
    %66 = vector.broadcast %65 : vector<2x1x8x32xf32> to vector<2x8x8x32xf32>
    %67 = vector.shape_cast %66 : vector<2x8x8x32xf32> to vector<128x32xf32>
    %68 = arith.mulf %63, %67 : vector<128x32xf32>
    %cst_21 = arith.constant dense<0.000000e+00> : vector<16x32xf32>
    %69 = tpu.matmul %32, %68, %cst_21 {dimension_numbers = #tpu.dot_dimension_numbers<[1], [0], [0], [1], [0, 0, 1, 1], [], []>} : vector<16x128xf32>, vector<128x32xf32>, vector<16x32xf32> -> vector<16x32xf32>
    %cst_22 = arith.constant dense<0.000000e+00> : vector<16x32xf32>
    %70 = tpu.matmul %32, %63, %cst_22 {dimension_numbers = #tpu.dot_dimension_numbers<[1], [0], [0], [1], [0, 0, 1, 1], [], []>} : vector<16x128xf32>, vector<128x32xf32>, vector<16x32xf32> -> vector<16x32xf32>
    %71 = tpu.reciprocal %70 {approx = true} : vector<16x32xf32> -> vector<16x32xf32>
    %72 = arith.mulf %69, %71 : vector<16x32xf32>
    %73 = vector.extract_strided_slice %40 {offsets = [0, 0], sizes = [32, 32], strides = [1, 1]} : vector<32x96xf32> to vector<32x32xf32>
    %cst_23 = arith.constant dense<0.000000e+00> : vector<16x32xf32>
    %74 = tpu.matmul %72, %73, %cst_23 {dimension_numbers = #tpu.dot_dimension_numbers<[1], [0], [0], [1], [0, 0, 1, 1], [], []>} : vector<16x32xf32>, vector<32x32xf32>, vector<16x32xf32> -> vector<16x32xf32>
    %75 = vector.extract_strided_slice %38 {offsets = [2, 0], sizes = [1, 32], strides = [1, 1]} : vector<8x96xf32> to vector<1x32xf32>
    %76 = vector.broadcast %75 : vector<1x32xf32> to vector<16x32xf32>
    %77 = arith.addf %74, %76 : vector<16x32xf32>
    %78 = arith.addf %35, %77 : vector<16x32xf32>
    %79 = vector.extract_strided_slice %38 {offsets = [3, 0], sizes = [1, 32], strides = [1, 1]} : vector<8x96xf32> to vector<1x32xf32>
    %80 = vector.extract_strided_slice %38 {offsets = [4, 0], sizes = [1, 32], strides = [1, 1]} : vector<8x96xf32> to vector<1x32xf32>
    %cst_24 = arith.constant dense<0.000000e+00> : vector<16xf32>
    %81 = vector.multi_reduction <add>, %78, %cst_24 [1] : vector<16x32xf32> to vector<16xf32>
    %82 = vector.shape_cast %81 : vector<16xf32> to vector<16x1xf32>
    %cst_25 = arith.constant 3.200000e+01 : f32
    %83 = vector.broadcast %cst_25 : f32 to vector<16x1xf32>
    %84 = arith.divf %82, %83 : vector<16x1xf32>
    %85 = vector.broadcast %84 : vector<16x1xf32> to vector<16x32xf32>
    %86 = arith.subf %78, %85 : vector<16x32xf32>
    %87 = arith.mulf %86, %86 : vector<16x32xf32>
    %cst_26 = arith.constant dense<0.000000e+00> : vector<16xf32>
    %88 = vector.multi_reduction <add>, %87, %cst_26 [1] : vector<16x32xf32> to vector<16xf32>
    %89 = vector.shape_cast %88 : vector<16xf32> to vector<16x1xf32>
    %cst_27 = arith.constant 3.200000e+01 : f32
    %90 = vector.broadcast %cst_27 : f32 to vector<16x1xf32>
    %91 = arith.divf %89, %90 : vector<16x1xf32>
    %92 = vector.broadcast %84 : vector<16x1xf32> to vector<16x32xf32>
    %93 = arith.subf %78, %92 : vector<16x32xf32>
    %cst_28 = arith.constant 9.99999974E-6 : f32
    %94 = vector.broadcast %cst_28 : f32 to vector<16x1xf32>
    %95 = arith.addf %91, %94 : vector<16x1xf32>
    %96 = math.rsqrt %95 : vector<16x1xf32>
    %97 = vector.broadcast %96 : vector<16x1xf32> to vector<16x32xf32>
    %98 = arith.mulf %93, %97 : vector<16x32xf32>
    %99 = vector.broadcast %79 : vector<1x32xf32> to vector<16x32xf32>
    %100 = arith.mulf %98, %99 : vector<16x32xf32>
    %101 = vector.broadcast %80 : vector<1x32xf32> to vector<16x32xf32>
    %102 = arith.addf %100, %101 : vector<16x32xf32>
    %103 = vector.extract_strided_slice %40 {offsets = [0, 32], sizes = [32, 64], strides = [1, 1]} : vector<32x96xf32> to vector<32x64xf32>
    %cst_29 = arith.constant dense<0.000000e+00> : vector<16x64xf32>
    %104 = tpu.matmul %102, %103, %cst_29 {dimension_numbers = #tpu.dot_dimension_numbers<[1], [0], [0], [1], [0, 0, 1, 1], [], []>} : vector<16x32xf32>, vector<32x64xf32>, vector<16x64xf32> -> vector<16x64xf32>
    %105 = vector.extract_strided_slice %38 {offsets = [1, 0], sizes = [1, 64], strides = [1, 1]} : vector<8x96xf32> to vector<1x64xf32>
    %106 = vector.broadcast %105 : vector<1x64xf32> to vector<16x64xf32>
    %107 = arith.addf %104, %106 : vector<16x64xf32>
    %cst_30 = arith.constant 0.000000e+00 : f32
    %108 = vector.broadcast %cst_30 : f32 to vector<16x64xf32>
    %109 = arith.maximumf %107, %108 : vector<16x64xf32>
    %c0_31 = arith.constant 0 : index
    %c0_32 = arith.constant 0 : index
    %c0_33 = arith.constant 0 : index
    %110 = vector.load %arg6[%c0_31, %c0_32, %c0_33] : memref<2x64x32xf32, #tpu.memory_space<vmem>>, vector<1x64x32xf32>
    %111 = vector.shape_cast %110 : vector<1x64x32xf32> to vector<64x32xf32>
    %cst_34 = arith.constant dense<0.000000e+00> : vector<16x32xf32>
    %112 = tpu.matmul %109, %111, %cst_34 {dimension_numbers = #tpu.dot_dimension_numbers<[1], [0], [0], [1], [0, 0, 1, 1], [], []>} : vector<16x64xf32>, vector<64x32xf32>, vector<16x32xf32> -> vector<16x32xf32>
    %113 = vector.extract_strided_slice %38 {offsets = [5, 0], sizes = [1, 32], strides = [1, 1]} : vector<8x96xf32> to vector<1x32xf32>
    %114 = vector.broadcast %113 : vector<1x32xf32> to vector<16x32xf32>
    %115 = arith.addf %112, %114 : vector<16x32xf32>
    %116 = arith.addf %102, %115 : vector<16x32xf32>
    %117 = vector.extract_strided_slice %38 {offsets = [6, 0], sizes = [1, 32], strides = [1, 1]} : vector<8x96xf32> to vector<1x32xf32>
    %118 = vector.extract_strided_slice %38 {offsets = [7, 0], sizes = [1, 32], strides = [1, 1]} : vector<8x96xf32> to vector<1x32xf32>
    %cst_35 = arith.constant dense<0.000000e+00> : vector<16xf32>
    %119 = vector.multi_reduction <add>, %116, %cst_35 [1] : vector<16x32xf32> to vector<16xf32>
    %120 = vector.shape_cast %119 : vector<16xf32> to vector<16x1xf32>
    %cst_36 = arith.constant 3.200000e+01 : f32
    %121 = vector.broadcast %cst_36 : f32 to vector<16x1xf32>
    %122 = arith.divf %120, %121 : vector<16x1xf32>
    %123 = vector.broadcast %122 : vector<16x1xf32> to vector<16x32xf32>
    %124 = arith.subf %116, %123 : vector<16x32xf32>
    %125 = arith.mulf %124, %124 : vector<16x32xf32>
    %cst_37 = arith.constant dense<0.000000e+00> : vector<16xf32>
    %126 = vector.multi_reduction <add>, %125, %cst_37 [1] : vector<16x32xf32> to vector<16xf32>
    %127 = vector.shape_cast %126 : vector<16xf32> to vector<16x1xf32>
    %cst_38 = arith.constant 3.200000e+01 : f32
    %128 = vector.broadcast %cst_38 : f32 to vector<16x1xf32>
    %129 = arith.divf %127, %128 : vector<16x1xf32>
    %130 = vector.broadcast %122 : vector<16x1xf32> to vector<16x32xf32>
    %131 = arith.subf %116, %130 : vector<16x32xf32>
    %cst_39 = arith.constant 9.99999974E-6 : f32
    %132 = vector.broadcast %cst_39 : f32 to vector<16x1xf32>
    %133 = arith.addf %129, %132 : vector<16x1xf32>
    %134 = math.rsqrt %133 : vector<16x1xf32>
    %135 = vector.broadcast %134 : vector<16x1xf32> to vector<16x32xf32>
    %136 = arith.mulf %131, %135 : vector<16x32xf32>
    %137 = vector.broadcast %117 : vector<1x32xf32> to vector<16x32xf32>
    %138 = arith.mulf %136, %137 : vector<16x32xf32>
    %139 = vector.broadcast %118 : vector<1x32xf32> to vector<16x32xf32>
    %140 = arith.addf %138, %139 : vector<16x32xf32>
    %c1 = arith.constant 1 : index
    %c0_40 = arith.constant 0 : index
    %c0_41 = arith.constant 0 : index
    %141 = vector.load %arg7[%c1, %c0_40, %c0_41] : memref<2x8x96xf32, #tpu.memory_space<vmem>>, vector<1x8x96xf32>
    %142 = vector.shape_cast %141 : vector<1x8x96xf32> to vector<8x96xf32>
    %c1_42 = arith.constant 1 : index
    %c0_43 = arith.constant 0 : index
    %c0_44 = arith.constant 0 : index
    %143 = vector.load %arg5[%c1_42, %c0_43, %c0_44] : memref<2x32x96xf32, #tpu.memory_space<vmem>>, vector<1x32x96xf32>
    %144 = vector.shape_cast %143 : vector<1x32x96xf32> to vector<32x96xf32>
    %c1_45 = arith.constant 1 : index
    %c0_46 = arith.constant 0 : index
    %c0_47 = arith.constant 0 : index
    %145 = vector.load %arg4[%c1_45, %c0_46, %c0_47] : memref<2x32x96xf32, #tpu.memory_space<vmem>>, vector<1x32x96xf32>
    %146 = vector.shape_cast %145 : vector<1x32x96xf32> to vector<32x96xf32>
    %cst_48 = arith.constant dense<0.000000e+00> : vector<16x96xf32>
    %147 = tpu.matmul %140, %146, %cst_48 {dimension_numbers = #tpu.dot_dimension_numbers<[1], [0], [0], [1], [0, 0, 1, 1], [], []>} : vector<16x32xf32>, vector<32x96xf32>, vector<16x96xf32> -> vector<16x96xf32>
    %148 = vector.extract_strided_slice %142 {offsets = [0, 0], sizes = [1, 96], strides = [1, 1]} : vector<8x96xf32> to vector<1x96xf32>
    %149 = vector.broadcast %148 : vector<1x96xf32> to vector<16x96xf32>
    %150 = arith.addf %147, %149 : vector<16x96xf32>
    %151 = vector.extract_strided_slice %150 {offsets = [0, 0], sizes = [16, 32], strides = [1, 1]} : vector<16x96xf32> to vector<16x32xf32>
    %152 = vector.shape_cast %151 : vector<16x32xf32> to vector<2x8x32xf32>
    %153 = vector.extract_strided_slice %150 {offsets = [0, 32], sizes = [16, 32], strides = [1, 1]} : vector<16x96xf32> to vector<16x32xf32>
    %154 = vector.shape_cast %153 : vector<16x32xf32> to vector<2x8x32xf32>
    %155 = vector.extract_strided_slice %150 {offsets = [0, 64], sizes = [16, 32], strides = [1, 1]} : vector<16x96xf32> to vector<16x32xf32>
    %156 = vector.shape_cast %155 : vector<16x32xf32> to vector<2x8x32xf32>
    %157 = vector.shape_cast %152 : vector<2x8x32xf32> to vector<2x8x1x32xf32>
    %158 = vector.shape_cast %154 : vector<2x8x32xf32> to vector<2x1x8x32xf32>
    %159 = vector.broadcast %157 : vector<2x8x1x32xf32> to vector<2x8x8x32xf32>
    %160 = vector.broadcast %158 : vector<2x1x8x32xf32> to vector<2x8x8x32xf32>
    %161 = arith.mulf %159, %160 : vector<2x8x8x32xf32>
    %162 = vector.shape_cast %161 : vector<2x8x8x32xf32> to vector<128x32xf32>
    %cst_49 = arith.constant dense<0.000000e+00> : vector<128x8xf32>
    %163 = tpu.matmul %162, %10, %cst_49 {dimension_numbers = #tpu.dot_dimension_numbers<[1], [0], [0], [1], [0, 0, 1, 1], [], []>} : vector<128x32xf32>, vector<32x8xf32>, vector<128x8xf32> -> vector<128x8xf32>
    %164 = vector.broadcast %36 : vector<128x1xf32> to vector<128x8xf32>
    %165 = arith.addf %163, %164 : vector<128x8xf32>
    %166 = math.exp %165 : vector<128x8xf32>
    %cst_50 = arith.constant dense<0.000000e+00> : vector<128x32xf32>
    %167 = tpu.matmul %166, %21, %cst_50 {dimension_numbers = #tpu.dot_dimension_numbers<[1], [0], [0], [1], [0, 0, 1, 1], [], []>} : vector<128x8xf32>, vector<8x32xf32>, vector<128x32xf32> -> vector<128x32xf32>
    %168 = vector.shape_cast %156 : vector<2x8x32xf32> to vector<2x1x8x32xf32>
    %169 = vector.shape_cast %168 : vector<2x1x8x32xf32> to vector<2x1x8x32xf32>
    %170 = vector.broadcast %169 : vector<2x1x8x32xf32> to vector<2x8x8x32xf32>
    %171 = vector.shape_cast %170 : vector<2x8x8x32xf32> to vector<128x32xf32>
    %172 = arith.mulf %167, %171 : vector<128x32xf32>
    %cst_51 = arith.constant dense<0.000000e+00> : vector<16x32xf32>
    %173 = tpu.matmul %32, %172, %cst_51 {dimension_numbers = #tpu.dot_dimension_numbers<[1], [0], [0], [1], [0, 0, 1, 1], [], []>} : vector<16x128xf32>, vector<128x32xf32>, vector<16x32xf32> -> vector<16x32xf32>
    %cst_52 = arith.constant dense<0.000000e+00> : vector<16x32xf32>
    %174 = tpu.matmul %32, %167, %cst_52 {dimension_numbers = #tpu.dot_dimension_numbers<[1], [0], [0], [1], [0, 0, 1, 1], [], []>} : vector<16x128xf32>, vector<128x32xf32>, vector<16x32xf32> -> vector<16x32xf32>
    %175 = tpu.reciprocal %174 {approx = true} : vector<16x32xf32> -> vector<16x32xf32>
    %176 = arith.mulf %173, %175 : vector<16x32xf32>
    %177 = vector.extract_strided_slice %144 {offsets = [0, 0], sizes = [32, 32], strides = [1, 1]} : vector<32x96xf32> to vector<32x32xf32>
    %cst_53 = arith.constant dense<0.000000e+00> : vector<16x32xf32>
    %178 = tpu.matmul %176, %177, %cst_53 {dimension_numbers = #tpu.dot_dimension_numbers<[1], [0], [0], [1], [0, 0, 1, 1], [], []>} : vector<16x32xf32>, vector<32x32xf32>, vector<16x32xf32> -> vector<16x32xf32>
    %179 = vector.extract_strided_slice %142 {offsets = [2, 0], sizes = [1, 32], strides = [1, 1]} : vector<8x96xf32> to vector<1x32xf32>
    %180 = vector.broadcast %179 : vector<1x32xf32> to vector<16x32xf32>
    %181 = arith.addf %178, %180 : vector<16x32xf32>
    %182 = arith.addf %140, %181 : vector<16x32xf32>
    %183 = vector.extract_strided_slice %142 {offsets = [3, 0], sizes = [1, 32], strides = [1, 1]} : vector<8x96xf32> to vector<1x32xf32>
    %184 = vector.extract_strided_slice %142 {offsets = [4, 0], sizes = [1, 32], strides = [1, 1]} : vector<8x96xf32> to vector<1x32xf32>
    %cst_54 = arith.constant dense<0.000000e+00> : vector<16xf32>
    %185 = vector.multi_reduction <add>, %182, %cst_54 [1] : vector<16x32xf32> to vector<16xf32>
    %186 = vector.shape_cast %185 : vector<16xf32> to vector<16x1xf32>
    %cst_55 = arith.constant 3.200000e+01 : f32
    %187 = vector.broadcast %cst_55 : f32 to vector<16x1xf32>
    %188 = arith.divf %186, %187 : vector<16x1xf32>
    %189 = vector.broadcast %188 : vector<16x1xf32> to vector<16x32xf32>
    %190 = arith.subf %182, %189 : vector<16x32xf32>
    %191 = arith.mulf %190, %190 : vector<16x32xf32>
    %cst_56 = arith.constant dense<0.000000e+00> : vector<16xf32>
    %192 = vector.multi_reduction <add>, %191, %cst_56 [1] : vector<16x32xf32> to vector<16xf32>
    %193 = vector.shape_cast %192 : vector<16xf32> to vector<16x1xf32>
    %cst_57 = arith.constant 3.200000e+01 : f32
    %194 = vector.broadcast %cst_57 : f32 to vector<16x1xf32>
    %195 = arith.divf %193, %194 : vector<16x1xf32>
    %196 = vector.broadcast %188 : vector<16x1xf32> to vector<16x32xf32>
    %197 = arith.subf %182, %196 : vector<16x32xf32>
    %cst_58 = arith.constant 9.99999974E-6 : f32
    %198 = vector.broadcast %cst_58 : f32 to vector<16x1xf32>
    %199 = arith.addf %195, %198 : vector<16x1xf32>
    %200 = math.rsqrt %199 : vector<16x1xf32>
    %201 = vector.broadcast %200 : vector<16x1xf32> to vector<16x32xf32>
    %202 = arith.mulf %197, %201 : vector<16x32xf32>
    %203 = vector.broadcast %183 : vector<1x32xf32> to vector<16x32xf32>
    %204 = arith.mulf %202, %203 : vector<16x32xf32>
    %205 = vector.broadcast %184 : vector<1x32xf32> to vector<16x32xf32>
    %206 = arith.addf %204, %205 : vector<16x32xf32>
    %207 = vector.extract_strided_slice %144 {offsets = [0, 32], sizes = [32, 64], strides = [1, 1]} : vector<32x96xf32> to vector<32x64xf32>
    %cst_59 = arith.constant dense<0.000000e+00> : vector<16x64xf32>
    %208 = tpu.matmul %206, %207, %cst_59 {dimension_numbers = #tpu.dot_dimension_numbers<[1], [0], [0], [1], [0, 0, 1, 1], [], []>} : vector<16x32xf32>, vector<32x64xf32>, vector<16x64xf32> -> vector<16x64xf32>
    %209 = vector.extract_strided_slice %142 {offsets = [1, 0], sizes = [1, 64], strides = [1, 1]} : vector<8x96xf32> to vector<1x64xf32>
    %210 = vector.broadcast %209 : vector<1x64xf32> to vector<16x64xf32>
    %211 = arith.addf %208, %210 : vector<16x64xf32>
    %cst_60 = arith.constant 0.000000e+00 : f32
    %212 = vector.broadcast %cst_60 : f32 to vector<16x64xf32>
    %213 = arith.maximumf %211, %212 : vector<16x64xf32>
    %c1_61 = arith.constant 1 : index
    %c0_62 = arith.constant 0 : index
    %c0_63 = arith.constant 0 : index
    %214 = vector.load %arg6[%c1_61, %c0_62, %c0_63] : memref<2x64x32xf32, #tpu.memory_space<vmem>>, vector<1x64x32xf32>
    %215 = vector.shape_cast %214 : vector<1x64x32xf32> to vector<64x32xf32>
    %cst_64 = arith.constant dense<0.000000e+00> : vector<16x32xf32>
    %216 = tpu.matmul %213, %215, %cst_64 {dimension_numbers = #tpu.dot_dimension_numbers<[1], [0], [0], [1], [0, 0, 1, 1], [], []>} : vector<16x64xf32>, vector<64x32xf32>, vector<16x32xf32> -> vector<16x32xf32>
    %217 = vector.extract_strided_slice %142 {offsets = [5, 0], sizes = [1, 32], strides = [1, 1]} : vector<8x96xf32> to vector<1x32xf32>
    %218 = vector.broadcast %217 : vector<1x32xf32> to vector<16x32xf32>
    %219 = arith.addf %216, %218 : vector<16x32xf32>
    %220 = arith.addf %206, %219 : vector<16x32xf32>
    %221 = vector.extract_strided_slice %142 {offsets = [6, 0], sizes = [1, 32], strides = [1, 1]} : vector<8x96xf32> to vector<1x32xf32>
    %222 = vector.extract_strided_slice %142 {offsets = [7, 0], sizes = [1, 32], strides = [1, 1]} : vector<8x96xf32> to vector<1x32xf32>
    %cst_65 = arith.constant dense<0.000000e+00> : vector<16xf32>
    %223 = vector.multi_reduction <add>, %220, %cst_65 [1] : vector<16x32xf32> to vector<16xf32>
    %224 = vector.shape_cast %223 : vector<16xf32> to vector<16x1xf32>
    %cst_66 = arith.constant 3.200000e+01 : f32
    %225 = vector.broadcast %cst_66 : f32 to vector<16x1xf32>
    %226 = arith.divf %224, %225 : vector<16x1xf32>
    %227 = vector.broadcast %226 : vector<16x1xf32> to vector<16x32xf32>
    %228 = arith.subf %220, %227 : vector<16x32xf32>
    %229 = arith.mulf %228, %228 : vector<16x32xf32>
    %cst_67 = arith.constant dense<0.000000e+00> : vector<16xf32>
    %230 = vector.multi_reduction <add>, %229, %cst_67 [1] : vector<16x32xf32> to vector<16xf32>
    %231 = vector.shape_cast %230 : vector<16xf32> to vector<16x1xf32>
    %cst_68 = arith.constant 3.200000e+01 : f32
    %232 = vector.broadcast %cst_68 : f32 to vector<16x1xf32>
    %233 = arith.divf %231, %232 : vector<16x1xf32>
    %234 = vector.broadcast %226 : vector<16x1xf32> to vector<16x32xf32>
    %235 = arith.subf %220, %234 : vector<16x32xf32>
    %cst_69 = arith.constant 9.99999974E-6 : f32
    %236 = vector.broadcast %cst_69 : f32 to vector<16x1xf32>
    %237 = arith.addf %233, %236 : vector<16x1xf32>
    %238 = math.rsqrt %237 : vector<16x1xf32>
    %239 = vector.broadcast %238 : vector<16x1xf32> to vector<16x32xf32>
    %240 = arith.mulf %235, %239 : vector<16x32xf32>
    %241 = vector.broadcast %221 : vector<1x32xf32> to vector<16x32xf32>
    %242 = arith.mulf %240, %241 : vector<16x32xf32>
    %243 = vector.broadcast %222 : vector<1x32xf32> to vector<16x32xf32>
    %244 = arith.addf %242, %243 : vector<16x32xf32>
    %245 = vector.shape_cast %244 : vector<16x32xf32> to vector<2x8x32xf32>
    %cst_70 = arith.constant dense<0.000000e+00> : vector<2x32xf32>
    %246 = vector.multi_reduction <add>, %245, %cst_70 [1] : vector<2x8x32xf32> to vector<2x32xf32>
    %cst_71 = arith.constant 8.000000e+00 : f32
    %247 = vector.broadcast %cst_71 : f32 to vector<2x32xf32>
    %248 = arith.divf %246, %247 : vector<2x32xf32>
    %c0_72 = arith.constant 0 : index
    %c0_73 = arith.constant 0 : index
    %249 = vector.load %arg8[%c0_72, %c0_73] : memref<33x5xf32, #tpu.memory_space<vmem>>, vector<32x5xf32>
    %cst_74 = arith.constant dense<0.000000e+00> : vector<2x5xf32>
    %250 = tpu.matmul %248, %249, %cst_74 {dimension_numbers = #tpu.dot_dimension_numbers<[1], [0], [0], [1], [0, 0, 1, 1], [], []>} : vector<2x32xf32>, vector<32x5xf32>, vector<2x5xf32> -> vector<2x5xf32>
    %c32 = arith.constant 32 : index
    %c0_75 = arith.constant 0 : index
    %251 = vector.load %arg8[%c32, %c0_75] : memref<33x5xf32, #tpu.memory_space<vmem>>, vector<1x5xf32>
    %252 = vector.broadcast %251 : vector<1x5xf32> to vector<2x5xf32>
    %253 = arith.addf %250, %252 : vector<2x5xf32>
    %c0_76 = arith.constant 0 : index
    %c0_77 = arith.constant 0 : index
    %254 = vector.load %arg9[%c0_76, %c0_77] : memref<2x5xf32, #tpu.memory_space<vmem>>, vector<2x5xf32>
    tpu.vector_store %arg9[%c0_76, %c0_77], %253 {strides = array<i32>} : memref<2x5xf32, #tpu.memory_space<vmem>>, vector<2x5xf32>,
    return
  }
  func.func @transform_0(%arg0: i32) -> (i32, i32) {
    %c0_i32 = arith.constant 0 : i32
    %c0_i32_0 = arith.constant 0 : i32
    %c0_i32_1 = arith.constant 0 : i32
    return %c0_i32, %c0_i32_0 : i32, i32
  }
  func.func @transform_1(%arg0: i32) -> (i32, i32) {
    %c0_i32 = arith.constant 0 : i32
    %c0_i32_0 = arith.constant 0 : i32
    %c0_i32_1 = arith.constant 0 : i32
    return %c0_i32, %c0_i32_0 : i32, i32
  }
  func.func @transform_2(%arg0: i32) -> (i32, i32) {
    %c0_i32 = arith.constant 0 : i32
    %c0_i32_0 = arith.constant 0 : i32
    %c0_i32_1 = arith.constant 0 : i32
    return %c0_i32, %c0_i32_0 : i32, i32
  }
  func.func @transform_3(%arg0: i32) -> (i32, i32, i32) {
    %c0_i32 = arith.constant 0 : i32
    %c0_i32_0 = arith.constant 0 : i32
    %c0_i32_1 = arith.constant 0 : i32
    %c0_i32_2 = arith.constant 0 : i32
    return %c0_i32, %c0_i32_0, %c0_i32_1 : i32, i32, i32
  }
  func.func @transform_4(%arg0: i32) -> (i32, i32, i32) {
    %c0_i32 = arith.constant 0 : i32
    %c0_i32_0 = arith.constant 0 : i32
    %c0_i32_1 = arith.constant 0 : i32
    %c0_i32_2 = arith.constant 0 : i32
    return %c0_i32, %c0_i32_0, %c0_i32_1 : i32, i32, i32
  }
  func.func @transform_5(%arg0: i32) -> (i32, i32, i32) {
    %c0_i32 = arith.constant 0 : i32
    %c0_i32_0 = arith.constant 0 : i32
    %c0_i32_1 = arith.constant 0 : i32
    %c0_i32_2 = arith.constant 0 : i32
    return %c0_i32, %c0_i32_0, %c0_i32_1 : i32, i32, i32
  }
  func.func @transform_6(%arg0: i32) -> (i32, i32, i32) {
    %c0_i32 = arith.constant 0 : i32
    %c0_i32_0 = arith.constant 0 : i32
    %c0_i32_1 = arith.constant 0 : i32
    %c0_i32_2 = arith.constant 0 : i32
    return %c0_i32, %c0_i32_0, %c0_i32_1 : i32, i32, i32
  }
  func.func @transform_7(%arg0: i32) -> (i32, i32) {
    %c0_i32 = arith.constant 0 : i32
    %c0_i32_0 = arith.constant 0 : i32
    %c0_i32_1 = arith.constant 0 : i32
    return %c0_i32, %c0_i32_0 : i32, i32
  }
  func.func @transform_8(%arg0: i32) -> (i32, i32) {
    %c0_i32 = arith.constant 0 : i32
    %c0_i32_0 = arith.constant 0 : i32
    %c0_i32_1 = arith.constant 0 : i32
    return %c0_i32, %c0_i32_0 : i32, i32
  }
}

</mosaic_0001>

<bundles_post_ra>
// kernel: tpu_custom_call.1
= control target key start
LH: loop header
LB: loop body
LE: loop exit
PB: predicated region body
PF: predicated region fallthrough
CT: control target
= control target key end

     0   :  { %vm85_vm0 = vcmask 195584   ;;  %s2507_s0 = inlined_call_operand.vmem [shape: f32[16,24], index: 0, kind: input, shape index: {}]   ;;  %s2508_s1 = inlined_call_operand.vmem [shape: f32[128,1], index: 1, kind: input, shape index: {}]   ;;  %s2509_s2 = inlined_call_operand.vmem [shape: f32[24,32], index: 2, kind: input, shape index: {}]   ;;  %s2510_s3 = inlined_call_operand.vmem [shape: f32[2,32,96], index: 3, kind: input, shape index: {}]   ;;  %s2511_s4 = inlined_call_operand.vmem [shape: f32[2,32,96], index: 4, kind: input, shape index: {}]   ;;  %s2512_s5 = inlined_call_operand.vmem [shape: f32[2,64,32], index: 5, kind: input, shape index: {}]   ;;  %s2513_s6 = inlined_call_operand.vmem [shape: f32[2,8,96], index: 6, kind: input, shape index: {}]   ;;  %s2514_s7 = inlined_call_operand.vmem [shape: f32[33,5], index: 7, kind: input, shape index: {}]   ;;  %s2515_s8 = inlined_call_operand.hbm [shape: f32[2,5], index: 8, kind: output, shape index: {}]  }
   0x1   :  { %v84_v0 = vld [vmem:[%s2509_s2 + $0x10] sm:$0xff]  ;;  %v83_v1 = vld [vmem:[%s2509_s2 + $0x8] sm:$0xff]  ;;  %v139_v2 = vld [vmem:[%s2510_s3 + $0x18] sm:$0xff] }
   0x2   :  { %105 = vmatpush.msra.mxu3 %v84_v0  ;;  %v82_v3 = vld [vmem:[%s2509_s2] sm:$0xff]  ;;  %160 = vmatpush.msra.mxu2 %v139_v2  ;;  %v138_v4 = vld [vmem:[%s2510_s3 + $0x10] sm:$0xff]  ;;  %v137_v6 = vld [vmem:[%s2510_s3 + $0x8] sm:$0xff] }
   0x3   :  { %v80_v5 = vld [vmem:[%s2507_s0] sm:$0xff] }
   0x4   :  { %106 = vmatpush.msra.mxu3 %v83_v1 }
   0x5   :  { %13 = vsyncpa [#allocation3], 0  ;;  %161 = vmatpush.msra.mxu2 %v138_v4  ;;  %v81_v7 = vld [vmem:[%s2507_s0 + $0x8] sm:$0xff]  ;;  %v136_v8 = vld [vmem:[%s2510_s3] sm:$0xff]  ;;  %v1890_v10 = vmov 0   ;;  %vm141_vm1 = vcmask 261120   ;;  %v30_v30 = vlaneseq }
   0x6   :  { %107 = vmatpush.msra.mxu3 %v82_v3  ;;  %v117_v9 = vld [vmem:[%s2508_s1 + $0x10] sm:$0xff]  ;;  %1749 = vset.pattern.permute.xlu2 %v1890_v10  ;;  %v118_v11 = vld [vmem:[%s2508_s1 + $0x18] sm:$0xff]  ;;  %v123_v14 = vld [vmem:[%s2508_s1 + $0x40] sm:$0xff]  ;;  %s1891_s20 = smov 64   ;;  %s1892_s21 = smov 96   ;;  %v1893_v38 = vmov 1.0  }
   0x7   :  { %1623 = vmatmul.msk.f32.vlgmr.msra.gmra.mxu3 %vm85_vm0, %v80_v5  ;;  %162 = vmatpush.msra.mxu2 %v137_v6  ;;  %v121_v12 = vld [vmem:[%s2508_s1 + $0x30] sm:$0xff]  ;;  %v126_v16 = vld [vmem:[%s2508_s1 + $0x58] sm:$0xff]  ;;  %v115_v18 = vld [vmem:[%s2508_s1] sm:$0xff]  ;;  %v2031_v31 = vshrl.u32 %v30_v30, 7  ;;  %v2033_v32 = vand.u32 127, %v30_v30  ;;  %s1896_s24 = smov [#allocation2]  }
   0x8   :  { %1748 = vset.pattern.permute.xlu1 %v1890_v10  ;;  %253 = vperm.xlu2 %1749, %v117_v9   ;;  %v129_v17 = vld [vmem:[%s2508_s1 + $0x70] sm:$0xff]  ;;  %v116_v19 = vld [vmem:[%s2508_s1 + $0x8] sm:$0xff]  ;;  %v2007_v21 = vld [vmem:[%s2513_s6] sm:$0xff]  ;;  %s1605_s25 = sshll.u32 %s1896_s24, 4  ;;  %s1607_s26 = sshll.u32 %s2515_s8, 4  ;;  %s1606_s25 = int_to_ptr.vmem [resolvable:$true] %s1605_s25  ;;  %s1608_s26 = int_to_ptr.hbm [resolvable:$true] %s1607_s26 }
   0x9   :  { %163 = vmatpush.msra.mxu2 %v136_v8  ;;  %1750 = vset.pattern.permute.xlu0 %v1890_v10  ;;  %v120_v20 = vld [vmem:[%s2508_s1 + $0x28] sm:$0xff]  ;;  %v140_v22 = vperm.slane %v2007_v21, 0  ;;  %v122_v25 = vld [vmem:[%s2508_s1 + $0x38] sm:$0xff]  ;;  %v125_v28 = vld [vmem:[%s2508_s1 + $0x50] sm:$0xff]  ;;  %v34_v33 = vadd.s32 24, %v2031_v31  ;;  %v37_v34 = vmul.u32 4, %v2033_v32 }
   0xa   :  { %243 = vperm.xlu1 %1748, %v115_v18   ;;  %v128_v29 = vld [vmem:[%s2508_s1 + $0x68] sm:$0xff]  ;;  %v33_v35 = vadd.s32 16, %v2031_v31  ;;  %v2053_v40 = vadd.s32 8, %v2031_v31  ;;  %v119_v43 = vld [vmem:[%s2508_s1 + $0x20] sm:$0xff]  ;;  %v130_v56 = vld [vmem:[%s2508_s1 + $0x78] sm:$0xff]  ;;  %v59_v30 = vmul.u32 4, %v2031_v31 }
   0xb   :  { %vm41_vm2 = vcmp.ge.s32.totalorder %v34_v33, %v37_v34  ;;  %v42_v36 = vadd.s32 4, %v37_v34  ;;  %vm38_vm11 = vcmp.ge.s32.totalorder %v2031_v31, %v37_v34  ;;  %v124_v48 = vld [vmem:[%s2508_s1 + $0x48] sm:$0xff]  ;;  %v127_v52 = vld [vmem:[%s2508_s1 + $0x60] sm:$0xff]  ;;  %v797_v41 = vperm.slane %v2007_v21, 5 }
   0xc   :  { %vm40_vm3 = vcmp.ge.s32.totalorder %v33_v35, %v37_v34  ;;  %vm39_vm8 = vcmp.ge.s32.totalorder %v2053_v40, %v37_v34  ;;  %vm60_vm14 = vcmp.ge.s32.totalorder %v2033_v32, %v59_v30 }
   0xd   :  { %vm46_vm4 = vcmp.lt.s32.totalorder %v34_v33, %v42_v36  ;;  %vm45_vm5 = vcmp.lt.s32.totalorder %v33_v35, %v42_v36  ;;  %vm44_vm9 = vcmp.lt.s32.totalorder %v2053_v40, %v42_v36  ;;  %vm43_vm12 = vcmp.lt.s32.totalorder %v2031_v31, %v42_v36 }
   0xe   :  { %vm2038_vm6 = vmand %vm41_vm2, %vm46_vm4  ;;  %v61_v33 = vadd.s32 4, %v59_v30  ;;  %vm466_vm2 = vcmask 64512  }
   0xf   :  { %1624 = vmatmul.msk.f32.gmra.mxu3 %vm85_vm0, %v81_v7  ;;  %1627 = vmatpush.msk.msrb.mxu2 %vm2038_vm6, %v1893_v38  ;;  %vm2045_vm7 = vmand %vm40_vm3, %vm45_vm5 }
  0x10   :  { %258 = vperm.xlu2 %1749, %v118_v11   ;;  %vm2057_vm10 = vmand %vm39_vm8, %vm44_vm9  ;;  %vm62_vm15 = vcmp.lt.s32.totalorder %v2033_v32, %v61_v33 }
  0x11   :  { %1628 = vmatpush.msk.msrb.mxu2 %vm2045_vm7, %v1893_v38  ;;  %vm2066_vm13 = vmand %vm38_vm11, %vm43_vm12 }
  0x12   :  { %248 = vperm.xlu1 %1748, %v116_v19   ;;  %vm2117_vm0 = vmand %vm60_vm14, %vm62_vm15 }
  0x13   :  { %1629 = vmatpush.msk.msrb.mxu2 %vm2057_vm10, %v1893_v38  ;;  %1647 = vmatpush.msk.msrb.mxu3 %vm2117_vm0, %v1893_v38 }
  0x15   :  { %1630 = vmatpush.msk.msrb.mxu2 %vm2066_vm13, %v1893_v38 }
  0x18   :  { %273 = vperm.xlu2 %1749, %v121_v12  }
  0x1a   :  { %268 = vperm.xlu1 %1748, %v120_v20  }
  0x20   :  { %283 = vperm.xlu2 %1749, %v123_v14  }
  0x22   :  { %278 = vperm.xlu1 %1748, %v122_v25  }
  0x28   :  { %298 = vperm.xlu2 %1749, %v126_v16  }
  0x2a   :  { %293 = vperm.xlu1 %1748, %v125_v28  }
  0x30   :  { %313 = vperm.xlu2 %1749, %v129_v17  }
  0x32   :  { %308 = vperm.xlu1 %1748, %v128_v29  }
  0x8a   :  { %v1978_v13 = vpop.f32.mrf.mxu3 }
  0x8b   :  { %1625 = vmatmul.msk.f32.vlgmr.msra.gmra.mxu2 %vm141_vm1, %v1978_v13 }
  0x92   :  { %v1985_v15 = vpop.f32.mrf.mxu3 }
  0x93   :  { %1626 = vmatmul.msk.f32.gmra.mxu2 %vm141_vm1, %v1985_v15 }
 0x10e   :  { %v165_v23 = vpop.f32.mrf.mxu2 }
 0x10f   :  { %v2010_v24 = vadd.f32 %v165_v23, %v140_v22 }
 0x111   :  { %580 = vrot.lane.b32.xlu2 %v2010_v24, %s1891_s20  ;;  %219 = vrot.lane.b32.xlu0 %v2010_v24, %s1892_s21  ;;  %v187_v44 = vperm.slane %v2010_v24, 0  ;;  %v173_v47 = vrot.slane %v2010_v24, 1  ;;  %v174_v51 = vrot.slane %v2010_v24, 2  ;;  %v175_v55 = vrot.slane %v2010_v24, 3 }
 0x112   :  { %v176_v59 = vrot.slane %v2010_v24, 4  ;;  %v177_v62 = vrot.slane %v2010_v24, 5  ;;  %v178_v1 = vrot.slane %v2010_v24, 6  ;;  %v179_v4 = vrot.slane %v2010_v24, 7 }
 0x113   :  { %v188_v49 = vperm.slane %v173_v47, 0  ;;  %v189_v53 = vperm.slane %v174_v51, 0  ;;  %v190_v57 = vperm.slane %v175_v55, 0 }
 0x114   :  { %v191_v60 = vperm.slane %v176_v59, 0  ;;  %v192_v63 = vperm.slane %v177_v62, 0  ;;  %v193_v2 = vperm.slane %v178_v1, 0  ;;  %v194_v5 = vperm.slane %v179_v4, 0 }
 0x116   :  { %v168_v26 = vpop.f32.mrf.mxu2 }
 0x117   :  { %v2019_v27 = vadd.f32 %v168_v26, %v140_v22 }
 0x119   :  { %221 = vrot.lane.b32.xlu0 %v2019_v27, %s1892_s21  ;;  %582 = vrot.lane.b32.xlu1 %v2019_v27, %s1891_s20  ;;  %v195_v8 = vperm.slane %v2019_v27, 0  ;;  %v180_v10 = vrot.slane %v2019_v27, 1  ;;  %v181_v14 = vrot.slane %v2019_v27, 2  ;;  %v182_v18 = vrot.slane %v2019_v27, 3 }
 0x11a   :  { %v183_v22 = vrot.slane %v2019_v27, 4  ;;  %v184_v25 = vrot.slane %v2019_v27, 5  ;;  %v185_v29 = vrot.slane %v2019_v27, 6 }
 0x11b   :  { %v196_v11 = vperm.slane %v180_v10, 0  ;;  %v197_v16 = vperm.slane %v181_v14, 0  ;;  %v198_v19 = vperm.slane %v182_v18, 0 }
 0x11c   :  { %v199_v23 = vperm.slane %v183_v22, 0  ;;  %v200_v26 = vperm.slane %v184_v25, 0  ;;  %v201_v34 = vperm.slane %v185_v29, 0 }
 0x121   :  { %263 = vperm.xlu0 %1750, %v119_v43   ;;  %v186_v43 = vrot.slane %v2019_v27, 7  ;;  %v2134_v27 = vpop.permute.xlu2 %253 }
 0x129   :  { %288 = vperm.xlu0 %1750, %v124_v48   ;;  %v2138_v59 = vpop.permute.xlu2 %258 }
 0x131   :  { %303 = vperm.xlu0 %1750, %v127_v52   ;;  %v2150_v10 = vpop.permute.xlu2 %273 }
 0x139   :  { %318 = vperm.xlu0 %1750, %v130_v56  }
 0x183   :  { %v220_v45 = vpop.permute.xlu0 %219 }
 0x184   :  { %v225_v46 = vmul.f32 %v220_v45, %v187_v44  ;;  %v226_v50 = vmul.f32 %v220_v45, %v188_v49  ;;  %v227_v54 = vmul.f32 %v220_v45, %v189_v53  ;;  %v228_v58 = vmul.f32 %v220_v45, %v190_v57 }
 0x185   :  { %v229_v61 = vmul.f32 %v220_v45, %v191_v60  ;;  %v230_v0 = vmul.f32 %v220_v45, %v192_v63  ;;  %v231_v3 = vmul.f32 %v220_v45, %v193_v2  ;;  %v232_v6 = vmul.f32 %v220_v45, %v194_v5 }
 0x186   :  { %1631 = vmatmul.msk.f32.vlgmr.msrb.gmra.mxu2 %vm141_vm1, %v225_v46  ;;  %v202_v44 = vperm.slane %v186_v43, 0  ;;  %v2127_v46 = vpop.permute.xlu1 %243 }
 0x18b   :  { %v222_v7 = vpop.permute.xlu0 %221 }
 0x18c   :  { %v233_v9 = vmul.f32 %v222_v7, %v195_v8  ;;  %v234_v12 = vmul.f32 %v222_v7, %v196_v11  ;;  %v235_v17 = vmul.f32 %v222_v7, %v197_v16  ;;  %v236_v20 = vmul.f32 %v222_v7, %v198_v19 }
 0x18d   :  { %v237_v24 = vmul.f32 %v222_v7, %v199_v23  ;;  %v238_v28 = vmul.f32 %v222_v7, %v200_v26  ;;  %v239_v35 = vmul.f32 %v222_v7, %v201_v34  ;;  %v240_v45 = vmul.f32 %v222_v7, %v202_v44  ;;  %v2158_v23 = vpop.permute.xlu2 %283 }
 0x18e   :  { %1632 = vmatmul.msk.f32.gmra.mxu2 %vm141_vm1, %v226_v50  ;;  %v2130_v50 = vpop.permute.xlu1 %248 }
 0x196   :  { %1633 = vmatmul.msk.f32.gmra.mxu2 %vm141_vm1, %v227_v54  ;;  %v2146_v5 = vpop.permute.xlu1 %268 }
 0x19e   :  { %1634 = vmatmul.msk.f32.gmra.mxu2 %vm141_vm1, %v228_v58 }
 0x1a6   :  { %1635 = vmatmul.msk.f32.gmra.mxu2 %vm141_vm1, %v229_v61 }
 0x1ae   :  { %1636 = vmatmul.msk.f32.gmra.mxu2 %vm141_vm1, %v230_v0  ;;  %v2142_v0 = vpop.permute.xlu0 %263 }
 0x1b6   :  { %1637 = vmatmul.msk.f32.gmra.mxu2 %vm141_vm1, %v231_v3  ;;  %v2162_v29 = vpop.permute.xlu0 %288 }
 0x1be   :  { %1638 = vmatmul.msk.f32.gmra.mxu2 %vm141_vm1, %v232_v6 }
 0x1c6   :  { %1639 = vmatmul.msk.f32.gmra.mxu2 %vm141_vm1, %v233_v9 }
 0x1ce   :  { %1640 = vmatmul.msk.f32.gmra.mxu2 %vm141_vm1, %v234_v12 }
 0x1d6   :  { %1641 = vmatmul.msk.f32.gmra.mxu2 %vm141_vm1, %v235_v17  ;;  %v2154_v17 = vpop.permute.xlu1 %278 }
 0x1de   :  { %1642 = vmatmul.msk.f32.gmra.mxu2 %vm141_vm1, %v236_v20  ;;  %v2166_v43 = vpop.permute.xlu1 %293 }
 0x1e6   :  { %1643 = vmatmul.msk.f32.gmra.mxu2 %vm141_vm1, %v237_v24 }
 0x1ee   :  { %1644 = vmatmul.msk.f32.gmra.mxu2 %vm141_vm1, %v238_v28 }
 0x1f6   :  { %1645 = vmatmul.msk.f32.gmra.mxu2 %vm141_vm1, %v239_v35 }
 0x1fe   :  { %1646 = vmatmul.msk.f32.gmra.mxu2 %vm141_vm1, %v240_v45 }
 0x209   :  { %v386_v47 = vpop.f32.mrf.mxu2 }
 0x20a   :  { %v387_v48 = vadd.f32 %v386_v47, %v2127_v46 }
 0x20c   :  { %v434_v49 = vmul.f32 1.442695, %v387_v48 }
 0x20e   :  { %1772 = vpow2.f32 %v434_v49  ;;  %v2170_v49 = vpop.permute.xlu2 %298 }
 0x211   :  { %v389_v51 = vpop.f32.mrf.mxu2 }
 0x212   :  { %v390_v52 = vadd.f32 %v389_v51, %v2130_v50 }
 0x214   :  { %v1773_v53 = vpop.eup %1772  ;;  %v436_v54 = vmul.f32 1.442695, %v390_v52 }
 0x215   :  { %1648 = vmatmul.msk.f32.vlgmr.msrb.gmra.mxu3 %vm466_vm2, %v1773_v53 }
 0x216   :  { %1774 = vpow2.f32 %v436_v54 }
 0x219   :  { %v392_v55 = vpop.f32.mrf.mxu2 }
 0x21a   :  { %v393_v56 = vadd.f32 %v392_v55, %v2134_v27  ;;  %v2174_v55 = vpop.permute.xlu0 %303 }
 0x21c   :  { %v1775_v57 = vpop.eup %1774  ;;  %v438_v58 = vmul.f32 1.442695, %v393_v56 }
 0x21d   :  { %1649 = vmatmul.msk.f32.gmra.mxu3 %vm466_vm2, %v1775_v57 }
 0x21e   :  { %1776 = vpow2.f32 %v438_v58 }
 0x221   :  { %v395_v60 = vpop.f32.mrf.mxu2 }
 0x222   :  { %v396_v61 = vadd.f32 %v395_v60, %v2138_v59 }
 0x224   :  { %v1777_v62 = vpop.eup %1776  ;;  %v440_v63 = vmul.f32 1.442695, %v396_v61  ;;  %v2178_v61 = vpop.permute.xlu1 %308 }
 0x225   :  { %1650 = vmatmul.msk.f32.gmra.mxu3 %vm466_vm2, %v1777_v62 }
 0x226   :  { %1778 = vpow2.f32 %v440_v63 }
 0x229   :  { %v398_v1 = vpop.f32.mrf.mxu2 }
 0x22a   :  { %v399_v2 = vadd.f32 %v398_v1, %v2142_v0 }
 0x22c   :  { %v1779_v3 = vpop.eup %1778  ;;  %v442_v4 = vmul.f32 1.442695, %v399_v2 }
 0x22d   :  { %1651 = vmatmul.msk.f32.gmra.mxu3 %vm466_vm2, %v1779_v3  ;;  %v2182_v3 = vpop.permute.xlu2 %313 }
 0x22e   :  { %1780 = vpow2.f32 %v442_v4 }
 0x231   :  { %v401_v6 = vpop.f32.mrf.mxu2 }
 0x232   :  { %v402_v7 = vadd.f32 %v401_v6, %v2146_v5 }
 0x234   :  { %v1781_v8 = vpop.eup %1780  ;;  %v444_v9 = vmul.f32 1.442695, %v402_v7 }
 0x235   :  { %1652 = vmatmul.msk.f32.gmra.mxu3 %vm466_vm2, %v1781_v8 }
 0x236   :  { %1782 = vpow2.f32 %v444_v9  ;;  %v2186_v9 = vpop.permute.xlu0 %318 }
 0x239   :  { %v404_v11 = vpop.f32.mrf.mxu2 }
 0x23a   :  { %v405_v12 = vadd.f32 %v404_v11, %v2150_v10 }
 0x23c   :  { %v1783_v14 = vpop.eup %1782  ;;  %v446_v16 = vmul.f32 1.442695, %v405_v12 }
 0x23d   :  { %1653 = vmatmul.msk.f32.gmra.mxu3 %vm466_vm2, %v1783_v14 }
 0x23e   :  { %1784 = vpow2.f32 %v446_v16 }
 0x241   :  { %v407_v18 = vpop.f32.mrf.mxu2 }
 0x242   :  { %v408_v19 = vadd.f32 %v407_v18, %v2154_v17 }
 0x244   :  { %v1785_v20 = vpop.eup %1784  ;;  %v448_v22 = vmul.f32 1.442695, %v408_v19 }
 0x245   :  { %1654 = vmatmul.msk.f32.gmra.mxu3 %vm466_vm2, %v1785_v20 }
 0x246   :  { %1786 = vpow2.f32 %v448_v22 }
 0x249   :  { %v410_v24 = vpop.f32.mrf.mxu2 }
 0x24a   :  { %v411_v25 = vadd.f32 %v410_v24, %v2158_v23 }
 0x24c   :  { %v1787_v26 = vpop.eup %1786  ;;  %v450_v28 = vmul.f32 1.442695, %v411_v25 }
 0x24d   :  { %1655 = vmatmul.msk.f32.gmra.mxu3 %vm466_vm2, %v1787_v26 }
 0x24e   :  { %1788 = vpow2.f32 %v450_v28 }
 0x251   :  { %v413_v30 = vpop.f32.mrf.mxu2 }
 0x252   :  { %v414_v33 = vadd.f32 %v413_v30, %v2162_v29 }
 0x254   :  { %v1789_v34 = vpop.eup %1788  ;;  %v452_v35 = vmul.f32 1.442695, %v414_v33 }
 0x255   :  { %1656 = vmatmul.msk.f32.gmra.mxu3 %vm466_vm2, %v1789_v34 }
 0x256   :  { %1790 = vpow2.f32 %v452_v35 }
 0x259   :  { %v416_v44 = vpop.f32.mrf.mxu2 }
 0x25a   :  { %v417_v45 = vadd.f32 %v416_v44, %v2166_v43 }
 0x25c   :  { %v1791_v47 = vpop.eup %1790  ;;  %v454_v48 = vmul.f32 1.442695, %v417_v45 }
 0x25d   :  { %1657 = vmatmul.msk.f32.gmra.mxu3 %vm466_vm2, %v1791_v47 }
 0x25e   :  { %1792 = vpow2.f32 %v454_v48 }
 0x261   :  { %v419_v51 = vpop.f32.mrf.mxu2 }
 0x262   :  { %v420_v52 = vadd.f32 %v419_v51, %v2170_v49  ;;  %v583_v51 = vpop.permute.xlu1 %582 }
 0x264   :  { %v1793_v53 = vpop.eup %1792  ;;  %v456_v54 = vmul.f32 1.442695, %v420_v52 }
 0x265   :  { %1658 = vmatmul.msk.f32.gmra.mxu3 %vm466_vm2, %v1793_v53 }
 0x266   :  { %1794 = vpow2.f32 %v456_v54 }
 0x269   :  { %v422_v56 = vpop.f32.mrf.mxu2 }
 0x26a   :  { %v423_v57 = vadd.f32 %v422_v56, %v2174_v55 }
 0x26c   :  { %v1795_v58 = vpop.eup %1794  ;;  %v458_v60 = vmul.f32 1.442695, %v423_v57 }
 0x26d   :  { %1659 = vmatmul.msk.f32.gmra.mxu3 %vm466_vm2, %v1795_v58 }
 0x26e   :  { %1796 = vpow2.f32 %v458_v60 }
 0x271   :  { %v425_v62 = vpop.f32.mrf.mxu2 }
 0x272   :  { %v426_v63 = vadd.f32 %v425_v62, %v2178_v61 }
 0x274   :  { %v1797_v1 = vpop.eup %1796  ;;  %v460_v2 = vmul.f32 1.442695, %v426_v63 }
 0x275   :  { %1660 = vmatmul.msk.f32.gmra.mxu3 %vm466_vm2, %v1797_v1  ;;  %v581_v1 = vpop.permute.xlu2 %580 }
 0x276   :  { %1798 = vpow2.f32 %v460_v2 }
 0x279   :  { %v428_v4 = vpop.f32.mrf.mxu2 }
 0x27a   :  { %v429_v6 = vadd.f32 %v428_v4, %v2182_v3  ;;  %v66_v4 = vmul.u32 8, %v2031_v31 }
 0x27c   :  { %v1799_v7 = vpop.eup %1798  ;;  %v462_v8 = vmul.f32 1.442695, %v429_v6  ;;  %vm68_vm3 = vcmp.ge.s32.totalorder %v2033_v32, %v66_v4 }
 0x27d   :  { %1661 = vmatmul.msk.f32.gmra.mxu3 %vm466_vm2, %v1799_v7 }
 0x27e   :  { %1800 = vpow2.f32 %v462_v8  ;;  %v70_v8 = vadd.s32 8, %v66_v4 }
 0x280   :  { %vm72_vm4 = vcmp.lt.s32.totalorder %v2033_v32, %v70_v8 }
 0x281   :  { %v431_v11 = vpop.f32.mrf.mxu2  ;;  %vm2201_vm5 = vmand %vm68_vm3, %vm72_vm4 }
 0x282   :  { %v432_v12 = vadd.f32 %v431_v11, %v2186_v9 }
 0x284   :  { %v1801_v14 = vpop.eup %1800  ;;  %v464_v16 = vmul.f32 1.442695, %v432_v12 }
 0x285   :  { %1662 = vmatmul.msk.f32.gmra.mxu3 %vm466_vm2, %v1801_v14  ;;  %v67_v14 = vmul.u32 8, %v2053_v40 }
 0x286   :  { %1802 = vpow2.f32 %v464_v16 }
 0x287   :  { %vm69_vm8 = vcmp.ge.s32.totalorder %v2033_v32, %v67_v14 }
 0x28c   :  { %v1803_v18 = vpop.eup %1802 }
 0x28d   :  { %1663 = vmatmul.msk.f32.gmra.mxu3 %vm466_vm2, %v1803_v18  ;;  %v1676_v18 = vld [vmem:[%s2511_s4 + $0x28] sm:$0xff] }
 0x298   :  { %v2191_v19 = vpop.f32.mrf.mxu3 }
 0x2a0   :  { %v2193_v20 = vpop.f32.mrf.mxu3 }
 0x2a1   :  { %v587_v16 = vmul.f32 %v581_v1, %v2193_v20 }
 0x2a8   :  { %v538_v22 = vpop.f32.mrf.mxu3 }
 0x2a9   :  { %v588_v31 = vmul.f32 %v581_v1, %v538_v22 }
 0x2b0   :  { %v541_v24 = vpop.f32.mrf.mxu3 }
 0x2b1   :  { %v589_v12 = vmul.f32 %v581_v1, %v541_v24 }
 0x2b8   :  { %v544_v25 = vpop.f32.mrf.mxu3 }
 0x2b9   :  { %v590_v11 = vmul.f32 %v581_v1, %v544_v25 }
 0x2c0   :  { %v547_v26 = vpop.f32.mrf.mxu3 }
 0x2c1   :  { %v591_v7 = vmul.f32 %v581_v1, %v547_v26 }
 0x2c8   :  { %v550_v28 = vpop.f32.mrf.mxu3 }
 0x2c9   :  { %v592_v6 = vmul.f32 %v581_v1, %v550_v28 }
 0x2d0   :  { %v553_v30 = vpop.f32.mrf.mxu3 }
 0x2d1   :  { %v593_v2 = vmul.f32 %v581_v1, %v553_v30 }
 0x2d8   :  { %v556_v33 = vpop.f32.mrf.mxu3 }
 0x2d9   :  { %v594_v63 = vmul.f32 %v583_v51, %v556_v33 }
 0x2e0   :  { %v559_v34 = vpop.f32.mrf.mxu3 }
 0x2e1   :  { %v595_v62 = vmul.f32 %v583_v51, %v559_v34 }
 0x2e8   :  { %v562_v35 = vpop.f32.mrf.mxu3 }
 0x2e9   :  { %v596_v60 = vmul.f32 %v583_v51, %v562_v35 }
 0x2f0   :  { %v565_v44 = vpop.f32.mrf.mxu3 }
 0x2f1   :  { %v597_v58 = vmul.f32 %v583_v51, %v565_v44 }
 0x2f8   :  { %v568_v45 = vpop.f32.mrf.mxu3 }
 0x2f9   :  { %v598_v57 = vmul.f32 %v583_v51, %v568_v45 }
 0x300   :  { %v571_v47 = vpop.f32.mrf.mxu3 }
 0x301   :  { %v599_v56 = vmul.f32 %v583_v51, %v571_v47 }
 0x308   :  { %v574_v48 = vpop.f32.mrf.mxu3 }
 0x309   :  { %v600_v54 = vmul.f32 %v583_v51, %v574_v48 }
 0x310   :  { %v577_v52 = vpop.f32.mrf.mxu3 }
 0x311   :  { %625 = vmatpush.msra.mxu1 %v577_v52  ;;  %v601_v53 = vmul.f32 %v583_v51, %v577_v52  ;;  %v652_v51 = vperm.slane %v2007_v21, 2 }
 0x313   :  { %602 = vmatpush.msra.mxu0 %v601_v53  ;;  %626 = vmatpush.msra.mxu1 %v574_v48 }
 0x315   :  { %603 = vmatpush.msra.mxu0 %v600_v54  ;;  %627 = vmatpush.msra.mxu1 %v571_v47 }
 0x317   :  { %604 = vmatpush.msra.mxu0 %v599_v56  ;;  %628 = vmatpush.msra.mxu1 %v568_v45 }
 0x319   :  { %605 = vmatpush.msra.mxu0 %v598_v57  ;;  %629 = vmatpush.msra.mxu1 %v565_v44 }
 0x31b   :  { %606 = vmatpush.msra.mxu0 %v597_v58  ;;  %630 = vmatpush.msra.mxu1 %v562_v35 }
 0x31d   :  { %607 = vmatpush.msra.mxu0 %v596_v60  ;;  %631 = vmatpush.msra.mxu1 %v559_v34 }
 0x31f   :  { %608 = vmatpush.msra.mxu0 %v595_v62  ;;  %632 = vmatpush.msra.mxu1 %v556_v33 }
 0x321   :  { %609 = vmatpush.msra.mxu0 %v594_v63  ;;  %633 = vmatpush.msra.mxu1 %v553_v30  ;;  %v1894_v63 = vmov 32.0  }
 0x323   :  { %610 = vmatpush.msra.mxu0 %v593_v2  ;;  %634 = vmatpush.msra.mxu1 %v550_v28 }
 0x325   :  { %611 = vmatpush.msra.mxu0 %v592_v6  ;;  %635 = vmatpush.msra.mxu1 %v547_v26  ;;  %v132_v26 = vld [vmem:[%s2511_s4] sm:$0xff] }
 0x327   :  { %612 = vmatpush.msra.mxu0 %v591_v7  ;;  %636 = vmatpush.msra.mxu1 %v544_v25  ;;  %v71_v25 = vadd.s32 8, %v67_v14 }
 0x329   :  { %613 = vmatpush.msra.mxu0 %v590_v11  ;;  %637 = vmatpush.msra.mxu1 %v541_v24  ;;  %v586_v24 = vmul.f32 %v581_v1, %v2191_v19  ;;  %vm73_vm9 = vcmp.lt.s32.totalorder %v2033_v32, %v71_v25  ;;  %v134_v32 = vld [vmem:[%s2511_s4 + $0x10] sm:$0xff] }
 0x32a   :  { %vm2215_vm11 = vmand %vm69_vm8, %vm73_vm9 }
 0x32b   :  { %614 = vmatpush.msra.mxu0 %v589_v12  ;;  %638 = vmatpush.msra.mxu1 %v538_v22  ;;  %v133_v22 = vld [vmem:[%s2511_s4 + $0x8] sm:$0xff] }
 0x32c   :  { %v1756_v28 = vpack.i.bf16 %v132_v26, %v133_v22 }
 0x32d   :  { %615 = vmatpush.msra.mxu0 %v588_v31  ;;  %639 = vmatpush.msra.mxu1 %v2193_v20 }
 0x32f   :  { %616 = vmatpush.msra.mxu0 %v587_v16  ;;  %640 = vmatpush.msra.mxu1 %v2191_v19  ;;  %v135_v19 = vld [vmem:[%s2511_s4 + $0x18] sm:$0xff] }
 0x330   :  { %1666 = vmatmul.msk.f32.vlgmr.msra.gmra.mxu1 %vm2201_vm5, %v1893_v38  ;;  %v1751_v20 = vpack.i.bf16 %v134_v32, %v135_v19 }
 0x331   :  { %617 = vmatpush.msra.mxu0 %v586_v24 }
 0x332   :  { %1664 = vmatmul.msk.f32.vlgmr.msra.gmra.mxu0 %vm2201_vm5, %v1893_v38 }
 0x333   :  { %671 = vmatpush.msrb.mxu0 %v135_v19 }
 0x335   :  { %672 = vmatpush.msrb.mxu0 %v134_v32 }
 0x337   :  { %673 = vmatpush.msrb.mxu0 %v133_v22 }
 0x338   :  { %1667 = vmatmul.msk.f32.gmra.mxu1 %vm2215_vm11, %v1893_v38 }
 0x339   :  { %674 = vmatpush.msrb.mxu0 %v132_v26 }
 0x33a   :  { %1665 = vmatmul.msk.f32.gmra.mxu0 %vm2215_vm11, %v1893_v38 }
 0x3ad   :  { %v642_v30 = vpop.f32.mrf.mxu1 }
 0x3ae   :  { %1804 = vrcp.f32 %v642_v30 }
 0x3af   :  { %v619_v33 = vpop.f32.mrf.mxu0 }
 0x3b4   :  { %v1805_v34 = vpop.eup %1804 }
 0x3b5   :  { %v650_v35 = vmul.f32 %v1805_v34, %v619_v33  ;;  %v645_v44 = vpop.f32.mrf.mxu1 }
 0x3b6   :  { %1806 = vrcp.f32 %v645_v44  ;;  %v796_v44 = vld [vmem:[%s2512_s5 + $0x38] sm:$0xff] }
 0x3b7   :  { %1668 = vmatmul.msk.f32.vlgmr.msrb.gmra.mxu0 %vm141_vm1, %v650_v35  ;;  %v622_v45 = vpop.f32.mrf.mxu0  ;;  %1808 = vrcp.f32 %v1894_v63 }
 0x3b8   :  { %813 = vmatpush.msra.mxu0 %v796_v44 }
 0x3bc   :  { %v1807_v47 = vpop.eup %1806 }
 0x3bd   :  { %v651_v48 = vmul.f32 %v1807_v47, %v622_v45  ;;  %v1809_v1 = vpop.eup %1808  ;;  %v795_v45 = vld [vmem:[%s2512_s5 + $0x30] sm:$0xff]  ;;  %v794_v47 = vld [vmem:[%s2512_s5 + $0x28] sm:$0xff] }
 0x3be   :  { %v691_v2 = vmul.f32 32.0, %v1809_v1  ;;  %vm695_vm12 = vweird.f32 %v1809_v1  ;;  %814 = vmatpush.msra.mxu0 %v795_v45 }
 0x3bf   :  { %1669 = vmatmul.msk.f32.gmra.mxu0 %vm141_vm1, %v651_v48 }
 0x3c0   :  { %v692_v4 = vsub.f32 1.0, %v691_v2  ;;  %815 = vmatpush.msra.mxu0 %v794_v47 }
 0x434   :  { %v676_v52 = vpop.f32.mrf.mxu0 }
 0x435   :  { %v677_v53 = vadd.f32 %v676_v52, %v652_v51  ;;  %v793_v52 = vld [vmem:[%s2512_s5 + $0x20] sm:$0xff] }
 0x436   :  { %816 = vmatpush.msra.mxu0 %v793_v52 }
 0x437   :  { %v682_v54 = vadd.f32 %v677_v53, %v1978_v13  ;;  %v693_v13 = vmul.f32 %v1809_v1, %v692_v4  ;;  %v735_v4 = vperm.slane %v2007_v21, 3 }
 0x439   :  { %v684_v56 = vsel %vm141_vm1, %v682_v54, 0.0  ;;  %v694_v6 = vadd.f32 %v1809_v1, %v693_v13 }
 0x43a   :  { %685 = vadd.xlane.f32.xlu0 %v684_v56  ;;  %v792_v56 = vld [vmem:[%s2512_s5 + $0x18] sm:$0xff] }
 0x43b   :  { %v2246_v7 = vsel %vm695_vm12, %v1809_v1, %v694_v6  ;;  %817 = vmatpush.msra.mxu0 %v792_v56  ;;  %vm798_vm12 = vcmask 523264  }
 0x43c   :  { %v679_v57 = vpop.f32.mrf.mxu0 }
 0x43d   :  { %v680_v58 = vadd.f32 %v679_v57, %v652_v51 }
 0x43f   :  { %v683_v60 = vadd.f32 %v680_v58, %v1985_v15 }
 0x441   :  { %v687_v62 = vsel %vm141_vm1, %v683_v60, 0.0 }
 0x442   :  { %688 = vadd.xlane.f32.xlu2 %v687_v62 }
 0x44e   :  { %1757 = vrot.lane.b32.xlu0 %v1756_v28, %s1892_s21 }
 0x45a   :  { %1752 = vrot.lane.b32.xlu2 %v1751_v20, %s1892_s21 }
 0x4ad   :  { %v686_v8 = vpop.xlane.xlu0 %685 }
 0x4ae   :  { %v697_v15 = vmul.f32 %v2246_v7, %v686_v8 }
 0x4b0   :  { %v699_v11 = vsub.f32 %v682_v54, %v697_v15  ;;  %v738_v15 = vperm.slane %v2007_v21, 4 }
 0x4b2   :  { %v701_v12 = vmul.f32 %v699_v11, %v699_v11 }
 0x4b4   :  { %v703_v14 = vsel %vm141_vm1, %v701_v12, 0.0 }
 0x4b5   :  { %704 = vadd.xlane.f32.xlu1 %v703_v14  ;;  %v689_v31 = vpop.xlane.xlu2 %688 }
 0x4b6   :  { %v698_v16 = vmul.f32 %v2246_v7, %v689_v31 }
 0x4b8   :  { %v700_v25 = vsub.f32 %v683_v60, %v698_v16 }
 0x4ba   :  { %v702_v24 = vmul.f32 %v700_v25, %v700_v25 }
 0x4bc   :  { %v706_v19 = vsel %vm141_vm1, %v702_v24, 0.0 }
 0x4bd   :  { %707 = vadd.xlane.f32.xlu1 %v706_v19  ;;  %v1753_v32 = vpop.permute.xlu2 %1752 }
 0x4be   :  { %v1754_v20 = vunpack.i.l.bf16 %v1753_v32  ;;  %v1755_v22 = vunpack.i.h.bf16 %v1753_v32 }
 0x4c0   :  { %776 = vmatpush.msrb.mxu1 %v1754_v20  ;;  %v1758_v26 = vpop.permute.xlu0 %1757 }
 0x4c1   :  { %v1759_v28 = vunpack.i.l.bf16 %v1758_v26  ;;  %v1760_v30 = vunpack.i.h.bf16 %v1758_v26  ;;  %v790_v26 = vld [vmem:[%s2512_s5 + $0x8] sm:$0xff] }
 0x4c2   :  { %777 = vmatpush.msrb.mxu1 %v1755_v22 }
 0x4c4   :  { %778 = vmatpush.msrb.mxu1 %v1759_v28  ;;  %v789_v28 = vld [vmem:[%s2512_s5] sm:$0xff] }
 0x4c6   :  { %779 = vmatpush.msrb.mxu1 %v1760_v30 }
 0x528   :  { %v705_v33 = vpop.xlane.xlu1 %704 }
 0x529   :  { %v709_v34 = vmul.f32 %v705_v33, %v2246_v7 }
 0x52b   :  { %v711_v35 = vadd.f32 1e-05, %v709_v34 }
 0x52d   :  { %1810 = vrsqrt.f32 %v711_v35  ;;  %vm719_vm15 = vweird.f32 %v711_v35 }
 0x530   :  { %v708_v48 = vpop.xlane.xlu1 %707 }
 0x531   :  { %v710_v51 = vmul.f32 %v708_v48, %v2246_v7 }
 0x533   :  { %v1811_v53 = vpop.eup %1810  ;;  %v712_v54 = vadd.f32 1e-05, %v710_v51 }
 0x534   :  { %v714_v57 = vmul.f32 %v1811_v53, %v711_v35  ;;  %vm720_vm14 = vweird.f32 %v1811_v53 }
 0x535   :  { %1812 = vrsqrt.f32 %v712_v54  ;;  %vm721_vm3 = vmor %vm719_vm15, %vm720_vm14  ;;  %vm729_vm8 = vweird.f32 %v712_v54 }
 0x536   :  { %v715_v58 = vmul.f32 %v1811_v53, %v714_v57 }
 0x538   :  { %v716_v60 = vmul.f32 0.5, %v715_v58 }
 0x53a   :  { %v717_v62 = vsub.f32 1.5, %v716_v60 }
 0x53b   :  { %v1813_v63 = vpop.eup %1812 }
 0x53c   :  { %v718_v1 = vmul.f32 %v1811_v53, %v717_v62  ;;  %v724_v2 = vmul.f32 %v1813_v63, %v712_v54  ;;  %vm730_vm4 = vweird.f32 %v1813_v63 }
 0x53d   :  { %vm731_vm9 = vmor %vm729_vm8, %vm730_vm4 }
 0x53e   :  { %v722_v13 = vsel %vm721_vm3, %v1811_v53, %v718_v1  ;;  %v725_v6 = vmul.f32 %v1813_v63, %v724_v2 }
 0x53f   :  { %v733_v8 = vmul.f32 %v722_v13, %v699_v11  ;;  %v791_v11 = vld [vmem:[%s2512_s5 + $0x10] sm:$0xff]  ;;  %v1682_v13 = vld [vmem:[%s2510_s3 + $0x38] sm:$0xff] }
 0x540   :  { %v726_v12 = vmul.f32 0.5, %v725_v6  ;;  %818 = vmatpush.msra.mxu0 %v791_v11  ;;  %911 = vmatpush.msra.mxu1 %v1682_v13  ;;  %v1681_v6 = vld [vmem:[%s2510_s3 + $0x30] sm:$0xff] }
 0x541   :  { %v736_v14 = vmul.f32 %v735_v4, %v733_v8  ;;  %v1680_v8 = vld [vmem:[%s2510_s3 + $0x28] sm:$0xff] }
 0x542   :  { %v727_v31 = vsub.f32 1.5, %v726_v12  ;;  %819 = vmatpush.msra.mxu0 %v790_v26  ;;  %912 = vmatpush.msra.mxu1 %v1681_v6 }
 0x543   :  { %v739_v16 = vadd.f32 %v738_v15, %v736_v14 }
 0x544   :  { %v728_v24 = vmul.f32 %v1813_v63, %v727_v31  ;;  %820 = vmatpush.msra.mxu0 %v789_v28  ;;  %913 = vmatpush.msra.mxu1 %v1680_v8 }
 0x545   :  { %1670 = vmatmul.msk.f32.vlgmr.msrb.gmra.mxu1 %vm141_vm1, %v739_v16 }
 0x546   :  { %v732_v19 = vsel %vm731_vm9, %v1813_v63, %v728_v24  ;;  %1685 = vmatpush.msk.msrb.mxu0 %vm2038_vm6, %v1893_v38 }
 0x547   :  { %v734_v32 = vmul.f32 %v732_v19, %v700_v25  ;;  %v741_v25 = vperm.slane %v2007_v21, 1 }
 0x548   :  { %1686 = vmatpush.msk.msrb.mxu0 %vm2045_vm7, %v1893_v38 }
 0x549   :  { %v737_v20 = vmul.f32 %v735_v4, %v734_v32 }
 0x54a   :  { %1687 = vmatpush.msk.msrb.mxu0 %vm2057_vm10, %v1893_v38 }
 0x54b   :  { %v740_v22 = vadd.f32 %v738_v15, %v737_v20  ;;  %v1679_v15 = vld [vmem:[%s2510_s3 + $0x20] sm:$0xff] }
 0x54c   :  { %1688 = vmatpush.msk.msrb.mxu0 %vm2066_vm13, %v1893_v38  ;;  %914 = vmatpush.msra.mxu1 %v1679_v15 }
 0x54d   :  { %1671 = vmatmul.msk.f32.gmra.mxu1 %vm141_vm1, %v740_v22 }
 0x54e   :  { %1705 = vmatpush.msk.msrb.mxu1 %vm2117_vm0, %v1893_v38 }
 0x5c2   :  { %v781_v30 = vpop.f32.mrf.mxu1 }
 0x5c3   :  { %v782_v33 = vadd.f32 %v781_v30, %v741_v25  ;;  %v874_v30 = vperm.slane %v2007_v21, 6 }
 0x5c5   :  { %v787_v34 = vmax.f32 %v782_v33, 0.0 }
 0x5c7   :  { %1672 = vmatmul.msk.f32.vlgmr.msra.gmra.mxu0 %vm798_vm12, %v787_v34 }
 0x5ca   :  { %v784_v37 = vpop.f32.mrf.mxu1 }
 0x5cb   :  { %v785_v35 = vadd.f32 %v784_v37, %v741_v25 }
 0x5cd   :  { %v788_v39 = vmax.f32 %v785_v35, 0.0  ;;  %v877_v35 = vperm.slane %v2007_v21, 7  ;;  %v2334_v21 = vld [vmem:[%s2513_s6 + $0x8] sm:$0xff] }
 0x5cf   :  { %1673 = vmatmul.msk.f32.gmra.mxu0 %vm798_vm12, %v788_v39 }
 0x644   :  { %v822_v44 = vpop.f32.mrf.mxu0 }
 0x645   :  { %v823_v45 = vadd.f32 %v822_v44, %v797_v41 }
 0x647   :  { %v828_v47 = vadd.f32 %v823_v45, %v739_v16 }
 0x649   :  { %v830_v42 = vsel %vm141_vm1, %v828_v47, 0.0 }
 0x64a   :  { %831 = vadd.xlane.f32.xlu1 %v830_v42 }
 0x64c   :  { %v825_v48 = vpop.f32.mrf.mxu0 }
 0x64d   :  { %v826_v51 = vadd.f32 %v825_v48, %v797_v41 }
 0x64f   :  { %v829_v52 = vadd.f32 %v826_v51, %v740_v22 }
 0x651   :  { %v833_v53 = vsel %vm141_vm1, %v829_v52, 0.0 }
 0x652   :  { %834 = vadd.xlane.f32.xlu0 %v833_v53  ;;  %v892_v53 = vperm.slane %v2334_v21, 0 }
 0x6bd   :  { %v832_v54 = vpop.xlane.xlu1 %831 }
 0x6be   :  { %v836_v56 = vmul.f32 %v832_v54, %v2246_v7 }
 0x6c0   :  { %v838_v57 = vsub.f32 %v828_v47, %v836_v56 }
 0x6c2   :  { %v840_v58 = vmul.f32 %v838_v57, %v838_v57 }
 0x6c4   :  { %v842_v60 = vsel %vm141_vm1, %v840_v58, 0.0 }
 0x6c5   :  { %v835_v62 = vpop.xlane.xlu0 %834  ;;  %843 = vadd.xlane.f32.xlu1 %v842_v60 }
 0x6c6   :  { %v837_v63 = vmul.f32 %v835_v62, %v2246_v7 }
 0x6c8   :  { %v839_v1 = vsub.f32 %v829_v52, %v837_v63 }
 0x6ca   :  { %v841_v2 = vmul.f32 %v839_v1, %v839_v1 }
 0x6cc   :  { %v845_v4 = vsel %vm141_vm1, %v841_v2, 0.0 }
 0x6cd   :  { %846 = vadd.xlane.f32.xlu2 %v845_v4 }
 0x738   :  { %v844_v12 = vpop.xlane.xlu1 %843 }
 0x739   :  { %v848_v14 = vmul.f32 %v844_v12, %v2246_v7 }
 0x73b   :  { %v850_v31 = vadd.f32 1e-05, %v848_v14 }
 0x73d   :  { %1814 = vrsqrt.f32 %v850_v31  ;;  %vm858_vm7 = vweird.f32 %v850_v31 }
 0x740   :  { %v847_v16 = vpop.xlane.xlu2 %846 }
 0x741   :  { %v849_v24 = vmul.f32 %v847_v16, %v2246_v7 }
 0x743   :  { %v1815_v19 = vpop.eup %1814  ;;  %v851_v32 = vadd.f32 1e-05, %v849_v24 }
 0x744   :  { %v853_v20 = vmul.f32 %v1815_v19, %v850_v31  ;;  %vm859_vm6 = vweird.f32 %v1815_v19 }
 0x745   :  { %1816 = vrsqrt.f32 %v851_v32  ;;  %vm860_vm10 = vmor %vm858_vm7, %vm859_vm6  ;;  %vm868_vm0 = vweird.f32 %v851_v32 }
 0x746   :  { %v854_v22 = vmul.f32 %v1815_v19, %v853_v20 }
 0x748   :  { %v855_v11 = vmul.f32 0.5, %v854_v22 }
 0x74a   :  { %v856_v26 = vsub.f32 1.5, %v855_v11 }
 0x74b   :  { %v1817_v28 = vpop.eup %1816 }
 0x74c   :  { %v857_v25 = vmul.f32 %v1815_v19, %v856_v26  ;;  %v863_v36 = vmul.f32 %v1817_v28, %v851_v32  ;;  %vm869_vm13 = vweird.f32 %v1817_v28 }
 0x74d   :  { %vm870_vm14 = vmor %vm868_vm0, %vm869_vm13  ;;  %vm1574_vm0 = vcmask 1041409  }
 0x74e   :  { %v861_v33 = vsel %vm860_vm10, %v1815_v19, %v857_v25  ;;  %v864_v34 = vmul.f32 %v1817_v28, %v863_v36 }
 0x74f   :  { %v872_v37 = vmul.f32 %v861_v33, %v838_v57 }
 0x750   :  { %v865_v39 = vmul.f32 0.5, %v864_v34 }
 0x751   :  { %v875_v41 = vmul.f32 %v874_v30, %v872_v37 }
 0x752   :  { %v866_v44 = vsub.f32 1.5, %v865_v39 }
 0x753   :  { %v2323_v45 = vadd.f32 %v877_v35, %v875_v41 }
 0x754   :  { %v867_v47 = vmul.f32 %v1817_v28, %v866_v44 }
 0x755   :  { %1683 = vmatmul.msk.f32.vlgmr.msra.gmra.mxu1 %vm141_vm1, %v2323_v45 }
 0x756   :  { %v871_v42 = vsel %vm870_vm14, %v1817_v28, %v867_v47  ;;  %vm1598_vm14 = vcmask 33792  }
 0x757   :  { %v873_v48 = vmul.f32 %v871_v42, %v839_v1 }
 0x759   :  { %v876_v51 = vmul.f32 %v874_v30, %v873_v48 }
 0x75b   :  { %v2327_v52 = vadd.f32 %v877_v35, %v876_v51 }
 0x75d   :  { %1684 = vmatmul.msk.f32.gmra.mxu1 %vm141_vm1, %v2327_v52 }
 0x7d2   :  { %v916_v54 = vpop.f32.mrf.mxu1 }
 0x7d3   :  { %v917_v56 = vadd.f32 %v916_v54, %v892_v53 }
 0x7d5   :  { %1250 = vrot.lane.b32.xlu0 %v917_v56, %s1891_s20  ;;  %970 = vrot.lane.b32.xlu1 %v917_v56, %s1892_s21  ;;  %v938_v60 = vperm.slane %v917_v56, 0  ;;  %v924_v1 = vrot.slane %v917_v56, 1  ;;  %v925_v13 = vrot.slane %v917_v56, 2  ;;  %v926_v15 = vrot.slane %v917_v56, 3 }
 0x7d6   :  { %v927_v31 = vrot.slane %v917_v56, 4  ;;  %v928_v19 = vrot.slane %v917_v56, 5  ;;  %v929_v22 = vrot.slane %v917_v56, 6  ;;  %v930_v28 = vrot.slane %v917_v56, 7 }
 0x7d7   :  { %v939_v2 = vperm.slane %v924_v1, 0  ;;  %v940_v6 = vperm.slane %v925_v13, 0  ;;  %v941_v12 = vperm.slane %v926_v15, 0 }
 0x7d8   :  { %v942_v16 = vperm.slane %v927_v31, 0  ;;  %v943_v32 = vperm.slane %v928_v19, 0  ;;  %v944_v11 = vperm.slane %v929_v22, 0  ;;  %v945_v25 = vperm.slane %v930_v28, 0 }
 0x7da   :  { %v919_v57 = vpop.f32.mrf.mxu1 }
 0x7db   :  { %v2339_v58 = vadd.f32 %v919_v57, %v892_v53 }
 0x7dd   :  { %972 = vrot.lane.b32.xlu1 %v2339_v58, %s1892_s21  ;;  %v946_v33 = vperm.slane %v2339_v58, 0  ;;  %v931_v37 = vrot.slane %v2339_v58, 1  ;;  %v932_v41 = vrot.slane %v2339_v58, 2  ;;  %v933_v42 = vrot.slane %v2339_v58, 3 }
 0x7de   :  { %v934_v53 = vrot.slane %v2339_v58, 4  ;;  %v935_v57 = vrot.slane %v2339_v58, 5 }
 0x7df   :  { %v947_v35 = vperm.slane %v931_v37, 0  ;;  %v948_v44 = vperm.slane %v932_v41, 0  ;;  %v949_v48 = vperm.slane %v933_v42, 0 }
 0x7e0   :  { %v950_v54 = vperm.slane %v934_v53, 0 }
 0x7e5   :  { %1252 = vrot.lane.b32.xlu1 %v2339_v58, %s1891_s20 }
 0x847   :  { %v971_v62 = vpop.permute.xlu1 %970 }
 0x848   :  { %v976_v63 = vmul.f32 %v971_v62, %v938_v60  ;;  %v977_v4 = vmul.f32 %v971_v62, %v939_v2  ;;  %v978_v8 = vmul.f32 %v971_v62, %v940_v6  ;;  %v979_v14 = vmul.f32 %v971_v62, %v941_v12 }
 0x849   :  { %v980_v24 = vmul.f32 %v971_v62, %v942_v16  ;;  %v981_v20 = vmul.f32 %v971_v62, %v943_v32  ;;  %v982_v26 = vmul.f32 %v971_v62, %v944_v11  ;;  %v983_v36 = vmul.f32 %v971_v62, %v945_v25 }
 0x84a   :  { %1689 = vmatmul.msk.f32.vlgmr.msrb.gmra.mxu0 %vm141_vm1, %v976_v63  ;;  %v951_v60 = vperm.slane %v935_v57, 0  ;;  %v936_v63 = vrot.slane %v2339_v58, 6 }
 0x84c   :  { %v952_v1 = vperm.slane %v936_v63, 0 }
 0x84f   :  { %v973_v30 = vpop.permute.xlu1 %972 }
 0x850   :  { %v984_v34 = vmul.f32 %v973_v30, %v946_v33  ;;  %v985_v39 = vmul.f32 %v973_v30, %v947_v35  ;;  %v986_v47 = vmul.f32 %v973_v30, %v948_v44  ;;  %v987_v51 = vmul.f32 %v973_v30, %v949_v48 }
 0x851   :  { %v988_v56 = vmul.f32 %v973_v30, %v950_v54  ;;  %v989_v62 = vmul.f32 %v973_v30, %v951_v60  ;;  %v990_v2 = vmul.f32 %v973_v30, %v952_v1 }
 0x852   :  { %1690 = vmatmul.msk.f32.gmra.mxu0 %vm141_vm1, %v977_v4  ;;  %v937_v4 = vrot.slane %v2339_v58, 7 }
 0x854   :  { %v953_v13 = vperm.slane %v937_v4, 0 }
 0x856   :  { %v991_v6 = vmul.f32 %v973_v30, %v953_v13 }
 0x85a   :  { %1691 = vmatmul.msk.f32.gmra.mxu0 %vm141_vm1, %v978_v8 }
 0x862   :  { %1692 = vmatmul.msk.f32.gmra.mxu0 %vm141_vm1, %v979_v14 }
 0x86a   :  { %1693 = vmatmul.msk.f32.gmra.mxu0 %vm141_vm1, %v980_v24 }
 0x872   :  { %1694 = vmatmul.msk.f32.gmra.mxu0 %vm141_vm1, %v981_v20 }
 0x87a   :  { %1695 = vmatmul.msk.f32.gmra.mxu0 %vm141_vm1, %v982_v26 }
 0x882   :  { %1696 = vmatmul.msk.f32.gmra.mxu0 %vm141_vm1, %v983_v36 }
 0x88a   :  { %1697 = vmatmul.msk.f32.gmra.mxu0 %vm141_vm1, %v984_v34 }
 0x892   :  { %1698 = vmatmul.msk.f32.gmra.mxu0 %vm141_vm1, %v985_v39 }
 0x89a   :  { %1699 = vmatmul.msk.f32.gmra.mxu0 %vm141_vm1, %v986_v47 }
 0x8a2   :  { %1700 = vmatmul.msk.f32.gmra.mxu0 %vm141_vm1, %v987_v51 }
 0x8aa   :  { %1701 = vmatmul.msk.f32.gmra.mxu0 %vm141_vm1, %v988_v56 }
 0x8b2   :  { %1702 = vmatmul.msk.f32.gmra.mxu0 %vm141_vm1, %v989_v62 }
 0x8ba   :  { %1703 = vmatmul.msk.f32.gmra.mxu0 %vm141_vm1, %v990_v2 }
 0x8c2   :  { %1704 = vmatmul.msk.f32.gmra.mxu0 %vm141_vm1, %v991_v6 }
 0x8c7   :  { %v1057_v8 = vpop.f32.mrf.mxu0 }
 0x8c8   :  { %v1058_v15 = vadd.f32 %v1057_v8, %v2127_v46 }
 0x8ca   :  { %v1105_v12 = vmul.f32 1.442695, %v1058_v15 }
 0x8cc   :  { %1818 = vpow2.f32 %v1105_v12 }
 0x8cf   :  { %v1060_v14 = vpop.f32.mrf.mxu0 }
 0x8d0   :  { %v1061_v31 = vadd.f32 %v1060_v14, %v2130_v50 }
 0x8d2   :  { %v1819_v16 = vpop.eup %1818  ;;  %v1107_v24 = vmul.f32 1.442695, %v1061_v31 }
 0x8d3   :  { %1706 = vmatmul.msk.f32.vlgmr.msrb.gmra.mxu1 %vm466_vm2, %v1819_v16 }
 0x8d4   :  { %1820 = vpow2.f32 %v1107_v24 }
 0x8d7   :  { %v1063_v19 = vpop.f32.mrf.mxu0 }
 0x8d8   :  { %v1064_v58 = vadd.f32 %v1063_v19, %v2134_v27 }
 0x8da   :  { %v1821_v32 = vpop.eup %1820  ;;  %v1109_v20 = vmul.f32 1.442695, %v1064_v58 }
 0x8db   :  { %1707 = vmatmul.msk.f32.gmra.mxu1 %vm466_vm2, %v1821_v32 }
 0x8dc   :  { %1822 = vpow2.f32 %v1109_v20 }
 0x8df   :  { %v1066_v22 = vpop.f32.mrf.mxu0 }
 0x8e0   :  { %v1067_v46 = vadd.f32 %v1066_v22, %v2138_v59 }
 0x8e2   :  { %v1823_v11 = vpop.eup %1822  ;;  %v1111_v26 = vmul.f32 1.442695, %v1067_v46 }
 0x8e3   :  { %1708 = vmatmul.msk.f32.gmra.mxu1 %vm466_vm2, %v1823_v11 }
 0x8e4   :  { %1824 = vpow2.f32 %v1111_v26 }
 0x8e7   :  { %v1069_v50 = vpop.f32.mrf.mxu0 }
 0x8e8   :  { %v1070_v28 = vadd.f32 %v1069_v50, %v2142_v0 }
 0x8ea   :  { %v1825_v25 = vpop.eup %1824  ;;  %v1113_v36 = vmul.f32 1.442695, %v1070_v28 }
 0x8eb   :  { %1709 = vmatmul.msk.f32.gmra.mxu1 %vm466_vm2, %v1825_v25 }
 0x8ec   :  { %1826 = vpow2.f32 %v1113_v36 }
 0x8ef   :  { %v1072_v27 = vpop.f32.mrf.mxu0 }
 0x8f0   :  { %v1073_v30 = vadd.f32 %v1072_v27, %v2146_v5 }
 0x8f2   :  { %v1827_v33 = vpop.eup %1826  ;;  %v1115_v34 = vmul.f32 1.442695, %v1073_v30 }
 0x8f3   :  { %1710 = vmatmul.msk.f32.gmra.mxu1 %vm466_vm2, %v1827_v33 }
 0x8f4   :  { %1828 = vpow2.f32 %v1115_v34  ;;  %v1253_v34 = vpop.permute.xlu1 %1252 }
 0x8f7   :  { %v1075_v59 = vpop.f32.mrf.mxu0 }
 0x8f8   :  { %v1076_v37 = vadd.f32 %v1075_v59, %v2150_v10 }
 0x8fa   :  { %v1829_v35 = vpop.eup %1828  ;;  %v1117_v39 = vmul.f32 1.442695, %v1076_v37 }
 0x8fb   :  { %1711 = vmatmul.msk.f32.gmra.mxu1 %vm466_vm2, %v1829_v35 }
 0x8fc   :  { %1830 = vpow2.f32 %v1117_v39 }
 0x8ff   :  { %v1078_v0 = vpop.f32.mrf.mxu0 }
 0x900   :  { %v1079_v41 = vadd.f32 %v1078_v0, %v2154_v17 }
 0x902   :  { %v1831_v44 = vpop.eup %1830  ;;  %v1119_v47 = vmul.f32 1.442695, %v1079_v41 }
 0x903   :  { %1712 = vmatmul.msk.f32.gmra.mxu1 %vm466_vm2, %v1831_v44 }
 0x904   :  { %1832 = vpow2.f32 %v1119_v47 }
 0x907   :  { %v1081_v5 = vpop.f32.mrf.mxu0 }
 0x908   :  { %v1082_v42 = vadd.f32 %v1081_v5, %v2158_v23 }
 0x90a   :  { %v1833_v48 = vpop.eup %1832  ;;  %v1121_v51 = vmul.f32 1.442695, %v1082_v42  ;;  %v1251_v42 = vpop.permute.xlu0 %1250 }
 0x90b   :  { %1713 = vmatmul.msk.f32.gmra.mxu1 %vm466_vm2, %v1833_v48 }
 0x90c   :  { %1834 = vpow2.f32 %v1121_v51 }
 0x90f   :  { %v1084_v10 = vpop.f32.mrf.mxu0 }
 0x910   :  { %v1085_v53 = vadd.f32 %v1084_v10, %v2162_v29 }
 0x912   :  { %v1835_v54 = vpop.eup %1834  ;;  %v1123_v56 = vmul.f32 1.442695, %v1085_v53 }
 0x913   :  { %1714 = vmatmul.msk.f32.gmra.mxu1 %vm466_vm2, %v1835_v54 }
 0x914   :  { %1836 = vpow2.f32 %v1123_v56 }
 0x917   :  { %v1087_v17 = vpop.f32.mrf.mxu0 }
 0x918   :  { %v1088_v57 = vadd.f32 %v1087_v17, %v2166_v43 }
 0x91a   :  { %v1837_v60 = vpop.eup %1836  ;;  %v1125_v62 = vmul.f32 1.442695, %v1088_v57 }
 0x91b   :  { %1715 = vmatmul.msk.f32.gmra.mxu1 %vm466_vm2, %v1837_v60  ;;  %v1678_v60 = vld [vmem:[%s2511_s4 + $0x38] sm:$0xff] }
 0x91c   :  { %1838 = vpow2.f32 %v1125_v62  ;;  %v1677_v62 = vld [vmem:[%s2511_s4 + $0x30] sm:$0xff] }
 0x91f   :  { %v1090_v23 = vpop.f32.mrf.mxu0 }
 0x920   :  { %v1091_v63 = vadd.f32 %v1090_v23, %v2170_v49  ;;  %v1761_v23 = vpack.i.bf16 %v1677_v62, %v1678_v60 }
 0x922   :  { %v1839_v1 = vpop.eup %1838  ;;  %v1127_v2 = vmul.f32 1.442695, %v1091_v63  ;;  %1762 = vrot.lane.b32.xlu0 %v1761_v23, %s1892_s21 }
 0x923   :  { %1716 = vmatmul.msk.f32.gmra.mxu1 %vm466_vm2, %v1839_v1 }
 0x924   :  { %1840 = vpow2.f32 %v1127_v2 }
 0x927   :  { %v1093_v29 = vpop.f32.mrf.mxu0 }
 0x928   :  { %v1094_v4 = vadd.f32 %v1093_v29, %v2174_v55 }
 0x92a   :  { %v1841_v13 = vpop.eup %1840  ;;  %v1129_v6 = vmul.f32 1.442695, %v1094_v4 }
 0x92b   :  { %1717 = vmatmul.msk.f32.gmra.mxu1 %vm466_vm2, %v1841_v13 }
 0x92c   :  { %1842 = vpow2.f32 %v1129_v6 }
 0x92f   :  { %v1096_v43 = vpop.f32.mrf.mxu0 }
 0x930   :  { %v1097_v8 = vadd.f32 %v1096_v43, %v2178_v61 }
 0x932   :  { %v1843_v15 = vpop.eup %1842  ;;  %v1131_v12 = vmul.f32 1.442695, %v1097_v8  ;;  %v1322_v8 = vperm.slane %v2334_v21, 2 }
 0x933   :  { %1718 = vmatmul.msk.f32.gmra.mxu1 %vm466_vm2, %v1843_v15 }
 0x934   :  { %1844 = vpow2.f32 %v1131_v12 }
 0x937   :  { %v1099_v49 = vpop.f32.mrf.mxu0 }
 0x938   :  { %v1100_v14 = vadd.f32 %v1099_v49, %v2182_v3 }
 0x93a   :  { %v1845_v31 = vpop.eup %1844  ;;  %v1133_v16 = vmul.f32 1.442695, %v1100_v14 }
 0x93b   :  { %1719 = vmatmul.msk.f32.gmra.mxu1 %vm466_vm2, %v1845_v31 }
 0x93c   :  { %1846 = vpow2.f32 %v1133_v16 }
 0x93f   :  { %v1102_v55 = vpop.f32.mrf.mxu0 }
 0x940   :  { %v1103_v24 = vadd.f32 %v1102_v55, %v2186_v9 }
 0x942   :  { %v1847_v19 = vpop.eup %1846  ;;  %v1135_v58 = vmul.f32 1.442695, %v1103_v24 }
 0x943   :  { %1720 = vmatmul.msk.f32.gmra.mxu1 %vm466_vm2, %v1847_v19 }
 0x944   :  { %1848 = vpow2.f32 %v1135_v58 }
 0x94a   :  { %v1849_v61 = vpop.eup %1848 }
 0x94b   :  { %1721 = vmatmul.msk.f32.gmra.mxu1 %vm466_vm2, %v1849_v61 }
 0x950   :  { %v2401_v32 = vpop.f32.mrf.mxu1 }
 0x951   :  { %v1256_v57 = vmul.f32 %v1251_v42, %v2401_v32 }
 0x958   :  { %v1205_v20 = vpop.f32.mrf.mxu1 }
 0x959   :  { %v1257_v17 = vmul.f32 %v1251_v42, %v1205_v20 }
 0x960   :  { %v1208_v3 = vpop.f32.mrf.mxu1 }
 0x961   :  { %v1258_v56 = vmul.f32 %v1251_v42, %v1208_v3 }
 0x968   :  { %v1211_v22 = vpop.f32.mrf.mxu1 }
 0x969   :  { %v1259_v54 = vmul.f32 %v1251_v42, %v1211_v22 }
 0x970   :  { %v1214_v46 = vpop.f32.mrf.mxu1 }
 0x971   :  { %v1260_v53 = vmul.f32 %v1251_v42, %v1214_v46 }
 0x978   :  { %v1217_v11 = vpop.f32.mrf.mxu1 }
 0x979   :  { %v1261_v10 = vmul.f32 %v1251_v42, %v1217_v11 }
 0x980   :  { %v1220_v26 = vpop.f32.mrf.mxu1 }
 0x981   :  { %v1262_v51 = vmul.f32 %v1251_v42, %v1220_v26 }
 0x988   :  { %v1223_v50 = vpop.f32.mrf.mxu1 }
 0x989   :  { %v1263_v48 = vmul.f32 %v1251_v42, %v1223_v50 }
 0x990   :  { %v1226_v28 = vpop.f32.mrf.mxu1 }
 0x991   :  { %v1264_v5 = vmul.f32 %v1253_v34, %v1226_v28 }
 0x998   :  { %v1229_v25 = vpop.f32.mrf.mxu1 }
 0x999   :  { %v1265_v47 = vmul.f32 %v1253_v34, %v1229_v25 }
 0x9a0   :  { %v1232_v9 = vpop.f32.mrf.mxu1 }
 0x9a1   :  { %v1266_v44 = vmul.f32 %v1253_v34, %v1232_v9 }
 0x9a8   :  { %v1235_v36 = vpop.f32.mrf.mxu1 }
 0x9a9   :  { %v1267_v41 = vmul.f32 %v1253_v34, %v1235_v36 }
 0x9b0   :  { %v1238_v27 = vpop.f32.mrf.mxu1 }
 0x9b1   :  { %v1268_v0 = vmul.f32 %v1253_v34, %v1238_v27 }
 0x9b8   :  { %v1241_v30 = vpop.f32.mrf.mxu1 }
 0x9b9   :  { %v1269_v39 = vmul.f32 %v1253_v34, %v1241_v30 }
 0x9c0   :  { %v1244_v33 = vpop.f32.mrf.mxu1 }
 0x9c1   :  { %v1270_v35 = vmul.f32 %v1253_v34, %v1244_v33 }
 0x9c8   :  { %v1247_v59 = vpop.f32.mrf.mxu1 }
 0x9c9   :  { %v1271_v37 = vmul.f32 %v1253_v34, %v1247_v59  ;;  %1295 = vmatpush.msra.mxu2 %v1247_v59  ;;  %v1734_v59 = vld [vmem:[%s2512_s5 + $0x60] sm:$0xff] }
 0x9cb   :  { %1272 = vmatpush.msra.mxu3 %v1271_v37  ;;  %1296 = vmatpush.msra.mxu2 %v1244_v33 }
 0x9cd   :  { %1273 = vmatpush.msra.mxu3 %v1270_v35  ;;  %1297 = vmatpush.msra.mxu2 %v1241_v30  ;;  %v1735_v30 = vld [vmem:[%s2512_s5 + $0x68] sm:$0xff] }
 0x9cf   :  { %1274 = vmatpush.msra.mxu3 %v1269_v39  ;;  %1298 = vmatpush.msra.mxu2 %v1238_v27  ;;  %v1736_v27 = vld [vmem:[%s2512_s5 + $0x70] sm:$0xff]  ;;  %v1733_v39 = vld [vmem:[%s2512_s5 + $0x58] sm:$0xff] }
 0x9d1   :  { %1275 = vmatpush.msra.mxu3 %v1268_v0  ;;  %1299 = vmatpush.msra.mxu2 %v1235_v36  ;;  %v1737_v36 = vld [vmem:[%s2512_s5 + $0x78] sm:$0xff] }
 0x9d3   :  { %1276 = vmatpush.msra.mxu3 %v1267_v41  ;;  %1300 = vmatpush.msra.mxu2 %v1232_v9 }
 0x9d5   :  { %1277 = vmatpush.msra.mxu3 %v1266_v44  ;;  %1301 = vmatpush.msra.mxu2 %v1229_v25 }
 0x9d7   :  { %1278 = vmatpush.msra.mxu3 %v1265_v47  ;;  %1302 = vmatpush.msra.mxu2 %v1226_v28 }
 0x9d9   :  { %1279 = vmatpush.msra.mxu3 %v1264_v5  ;;  %1303 = vmatpush.msra.mxu2 %v1223_v50 }
 0x9db   :  { %1280 = vmatpush.msra.mxu3 %v1263_v48  ;;  %1304 = vmatpush.msra.mxu2 %v1220_v26 }
 0x9dd   :  { %1281 = vmatpush.msra.mxu3 %v1262_v51  ;;  %1305 = vmatpush.msra.mxu2 %v1217_v11 }
 0x9df   :  { %1282 = vmatpush.msra.mxu3 %v1261_v10  ;;  %1306 = vmatpush.msra.mxu2 %v1214_v46 }
 0x9e1   :  { %1283 = vmatpush.msra.mxu3 %v1260_v53  ;;  %1307 = vmatpush.msra.mxu2 %v1211_v22 }
 0x9e3   :  { %1284 = vmatpush.msra.mxu3 %v1259_v54  ;;  %1308 = vmatpush.msra.mxu2 %v1208_v3  ;;  %v1398_v54 = vperm.slane %v2334_v21, 3 }
 0x9e5   :  { %1285 = vmatpush.msra.mxu3 %v1258_v56  ;;  %1309 = vmatpush.msra.mxu2 %v1205_v20 }
 0x9e7   :  { %1286 = vmatpush.msra.mxu3 %v1257_v17  ;;  %1310 = vmatpush.msra.mxu2 %v2401_v32 }
 0x9e8   :  { %1724 = vmatmul.msk.f32.vlgmr.msra.gmra.mxu2 %vm2201_vm5, %v1893_v38 }
 0x9e9   :  { %1287 = vmatpush.msra.mxu3 %v1256_v57 }
 0x9ea   :  { %1722 = vmatmul.msk.f32.vlgmr.msra.gmra.mxu3 %vm2201_vm5, %v1893_v38 }
 0x9eb   :  { %1341 = vmatpush.msrb.mxu3 %v1678_v60  ;;  %v1401_v60 = vperm.slane %v2334_v21, 4 }
 0x9ed   :  { %1342 = vmatpush.msrb.mxu3 %v1677_v62 }
 0x9ef   :  { %1343 = vmatpush.msrb.mxu3 %v1676_v18 }
 0x9f0   :  { %1725 = vmatmul.msk.f32.gmra.mxu2 %vm2215_vm11, %v1893_v38 }
 0x9f2   :  { %1723 = vmatmul.msk.f32.gmra.mxu3 %vm2215_vm11, %v1893_v38  ;;  %v1675_v38 = vld [vmem:[%s2511_s4 + $0x20] sm:$0xff] }
 0x9f3   :  { %v1766_v40 = vpack.i.bf16 %v1675_v38, %v1676_v18  ;;  %1344 = vmatpush.msrb.mxu3 %v1675_v38 }
 0x9f5   :  { %1476 = vmatpush.msra.mxu3 %v1737_v36 }
 0x9f7   :  { %1477 = vmatpush.msra.mxu3 %v1736_v27 }
 0x9f9   :  { %1478 = vmatpush.msra.mxu3 %v1735_v30 }
 0x9fb   :  { %1479 = vmatpush.msra.mxu3 %v1734_v59 }
 0x9fd   :  { %1480 = vmatpush.msra.mxu3 %v1733_v39  ;;  %v1566_v39 = vld [vmem:[%s2514_s7] sm:$0xff] }
 0xa6b   :  { %v1312_v63 = vpop.f32.mrf.mxu2 }
 0xa6c   :  { %1850 = vrcp.f32 %v1312_v63 }
 0xa6d   :  { %v1289_v1 = vpop.f32.mrf.mxu3 }
 0xa72   :  { %v1851_v2 = vpop.eup %1850 }
 0xa73   :  { %v1320_v29 = vmul.f32 %v1851_v2, %v1289_v1  ;;  %v1315_v4 = vpop.f32.mrf.mxu2 }
 0xa74   :  { %1852 = vrcp.f32 %v1315_v4  ;;  %v1732_v4 = vld [vmem:[%s2512_s5 + $0x50] sm:$0xff] }
 0xa75   :  { %1726 = vmatmul.msk.f32.vlgmr.msrb.gmra.mxu3 %vm141_vm1, %v1320_v29  ;;  %v1292_v13 = vpop.f32.mrf.mxu3 }
 0xa76   :  { %1481 = vmatpush.msra.mxu3 %v1732_v4 }
 0xa7a   :  { %v1853_v6 = vpop.eup %1852 }
 0xa7b   :  { %v1321_v43 = vmul.f32 %v1853_v6, %v1292_v13  ;;  %v1731_v13 = vld [vmem:[%s2512_s5 + $0x48] sm:$0xff]  ;;  %v1730_v6 = vld [vmem:[%s2512_s5 + $0x40] sm:$0xff] }
 0xa7c   :  { %1482 = vmatpush.msra.mxu3 %v1731_v13 }
 0xa7d   :  { %1727 = vmatmul.msk.f32.gmra.mxu3 %vm141_vm1, %v1321_v43  ;;  %v1404_v43 = vperm.slane %v2334_v21, 1 }
 0xa7e   :  { %1483 = vmatpush.msra.mxu3 %v1730_v6 }
 0xaf8   :  { %v1346_v15 = vpop.f32.mrf.mxu3 }
 0xaf9   :  { %v1347_v12 = vadd.f32 %v1346_v15, %v1322_v8 }
 0xafb   :  { %v1352_v49 = vadd.f32 %v1347_v12, %v2323_v45 }
 0xafd   :  { %v1354_v14 = vsel %vm141_vm1, %v1352_v49, 0.0 }
 0xafe   :  { %1355 = vadd.xlane.f32.xlu2 %v1354_v14 }
 0xb00   :  { %v1349_v31 = vpop.f32.mrf.mxu3 }
 0xb01   :  { %v1350_v16 = vadd.f32 %v1349_v31, %v1322_v8 }
 0xb03   :  { %v1353_v55 = vadd.f32 %v1350_v16, %v2327_v52  ;;  %v1763_v52 = vpop.permute.xlu0 %1762  ;;  %v1461_v16 = vperm.slane %v2334_v21, 5 }
 0xb04   :  { %v1764_v26 = vunpack.i.l.bf16 %v1763_v52  ;;  %v1765_v50 = vunpack.i.h.bf16 %v1763_v52 }
 0xb05   :  { %v1357_v24 = vsel %vm141_vm1, %v1353_v55, 0.0 }
 0xb06   :  { %1358 = vadd.xlane.f32.xlu1 %v1357_v24  ;;  %1439 = vmatpush.msrb.mxu2 %v1764_v26 }
 0xb08   :  { %1440 = vmatpush.msrb.mxu2 %v1765_v50 }
 0xb71   :  { %v1356_v19 = vpop.xlane.xlu2 %1355 }
 0xb72   :  { %v1360_v58 = vmul.f32 %v1356_v19, %v2246_v7 }
 0xb74   :  { %v1362_v61 = vsub.f32 %v1352_v49, %v1360_v58 }
 0xb76   :  { %v1364_v32 = vmul.f32 %v1362_v61, %v1362_v61 }
 0xb78   :  { %v1366_v20 = vsel %vm141_vm1, %v1364_v32, 0.0 }
 0xb79   :  { %1367 = vadd.xlane.f32.xlu2 %v1366_v20  ;;  %v1359_v3 = vpop.xlane.xlu1 %1358 }
 0xb7a   :  { %v1361_v45 = vmul.f32 %v1359_v3, %v2246_v7 }
 0xb7c   :  { %v1363_v22 = vsub.f32 %v1353_v55, %v1361_v45 }
 0xb7e   :  { %v1365_v46 = vmul.f32 %v1363_v22, %v1363_v22 }
 0xb80   :  { %v1369_v11 = vsel %vm141_vm1, %v1365_v46, 0.0 }
 0xb81   :  { %1370 = vadd.xlane.f32.xlu2 %v1369_v11 }
 0xb99   :  { %1767 = vrot.lane.b32.xlu2 %v1766_v40, %s1892_s21 }
 0xbec   :  { %v1368_v28 = vpop.xlane.xlu2 %1367 }
 0xbed   :  { %v1372_v25 = vmul.f32 %v1368_v28, %v2246_v7 }
 0xbef   :  { %v1374_v9 = vadd.f32 1e-05, %v1372_v25 }
 0xbf1   :  { %1854 = vrsqrt.f32 %v1374_v9  ;;  %vm1382_vm5 = vweird.f32 %v1374_v9 }
 0xbf4   :  { %v1371_v33 = vpop.xlane.xlu2 %1370 }
 0xbf5   :  { %v1373_v34 = vmul.f32 %v1371_v33, %v2246_v7  ;;  %v1569_v33 = vld [vmem:[%s2514_s7 + $0x18] sm:$0xff] }
 0xbf7   :  { %v1855_v37 = vpop.eup %1854  ;;  %v1375_v35 = vadd.f32 1e-05, %v1373_v34  ;;  %v1568_v34 = vld [vmem:[%s2514_s7 + $0x10] sm:$0xff] }
 0xbf8   :  { %v1377_v0 = vmul.f32 %v1855_v37, %v1374_v9  ;;  %vm1383_vm2 = vweird.f32 %v1855_v37 }
 0xbf9   :  { %1856 = vrsqrt.f32 %v1375_v35  ;;  %vm1384_vm11 = vmor %vm1382_vm5, %vm1383_vm2  ;;  %vm1392_vm3 = vweird.f32 %v1375_v35 }
 0xbfa   :  { %v1378_v41 = vmul.f32 %v1855_v37, %v1377_v0 }
 0xbfc   :  { %v1379_v44 = vmul.f32 0.5, %v1378_v41  ;;  %v1768_v47 = vpop.permute.xlu2 %1767 }
 0xbfd   :  { %v1770_v5 = vunpack.i.h.bf16 %v1768_v47  ;;  %v1769_v42 = vunpack.i.l.bf16 %v1768_v47 }
 0xbfe   :  { %v1380_v48 = vsub.f32 1.5, %v1379_v44 }
 0xbff   :  { %v1857_v51 = vpop.eup %1856  ;;  %1441 = vmatpush.msrb.mxu2 %v1769_v42 }
 0xc00   :  { %v1381_v10 = vmul.f32 %v1855_v37, %v1380_v48  ;;  %v1387_v53 = vmul.f32 %v1857_v51, %v1375_v35  ;;  %vm1393_vm15 = vweird.f32 %v1857_v51 }
 0xc01   :  { %1442 = vmatpush.msrb.mxu2 %v1770_v5  ;;  %vm1394_vm4 = vmor %vm1392_vm3, %vm1393_vm15 }
 0xc02   :  { %v1385_v56 = vsel %vm1384_vm11, %v1855_v37, %v1381_v10  ;;  %v1388_v17 = vmul.f32 %v1857_v51, %v1387_v53  ;;  %v1567_v37 = vld [vmem:[%s2514_s7 + $0x8] sm:$0xff] }
 0xc03   :  { %v1396_v57 = vmul.f32 %v1385_v56, %v1362_v61  ;;  %1590 = vmatpush.msra.mxu2 %v1569_v33  ;;  %v1895_v56 = vmov 8.0  }
 0xc04   :  { %v1389_v62 = vmul.f32 0.5, %v1388_v17  ;;  %v1540_v17 = vperm.slane %v2334_v21, 7 }
 0xc05   :  { %v1399_v23 = vmul.f32 %v1398_v54, %v1396_v57  ;;  %1591 = vmatpush.msra.mxu2 %v1568_v34 }
 0xc06   :  { %v1390_v18 = vsub.f32 1.5, %v1389_v62 }
 0xc07   :  { %v1402_v38 = vadd.f32 %v1401_v60, %v1399_v23  ;;  %1592 = vmatpush.msra.mxu2 %v1567_v37 }
 0xc08   :  { %v1391_v40 = vmul.f32 %v1857_v51, %v1390_v18 }
 0xc09   :  { %1728 = vmatmul.msk.f32.vlgmr.msrb.gmra.mxu2 %vm141_vm1, %v1402_v38 }
 0xc0a   :  { %v1395_v63 = vsel %vm1394_vm4, %v1857_v51, %v1391_v40  ;;  %1593 = vmatpush.msra.mxu2 %v1566_v39 }
 0xc0b   :  { %v1397_v1 = vmul.f32 %v1395_v63, %v1363_v22 }
 0xc0d   :  { %v1400_v2 = vmul.f32 %v1398_v54, %v1397_v1 }
 0xc0f   :  { %v1403_v29 = vadd.f32 %v1401_v60, %v1400_v2 }
 0xc11   :  { %1729 = vmatmul.msk.f32.gmra.mxu2 %vm141_vm1, %v1403_v29 }
 0xc8c   :  { %v1444_v8 = vpop.f32.mrf.mxu2 }
 0xc8d   :  { %v1445_v15 = vadd.f32 %v1444_v8, %v1404_v43 }
 0xc8f   :  { %v1450_v12 = vmax.f32 %v1445_v15, 0.0 }
 0xc91   :  { %1738 = vmatmul.msk.f32.vlgmr.msra.gmra.mxu3 %vm798_vm12, %v1450_v12 }
 0xc94   :  { %v1447_v49 = vpop.f32.mrf.mxu2 }
 0xc95   :  { %v1448_v14 = vadd.f32 %v1447_v49, %v1404_v43 }
 0xc97   :  { %v1451_v31 = vmax.f32 %v1448_v14, 0.0 }
 0xc99   :  { %1739 = vmatmul.msk.f32.gmra.mxu3 %vm798_vm12, %v1451_v31 }
 0xd14   :  { %v1485_v55 = vpop.f32.mrf.mxu3 }
 0xd15   :  { %v1486_v24 = vadd.f32 %v1485_v55, %v1461_v16 }
 0xd17   :  { %v1491_v19 = vadd.f32 %v1486_v24, %v1402_v38 }
 0xd19   :  { %v1493_v58 = vsel %vm141_vm1, %v1491_v19, 0.0 }
 0xd1a   :  { %1494 = vadd.xlane.f32.xlu0 %v1493_v58 }
 0xd1c   :  { %v1488_v61 = vpop.f32.mrf.mxu3 }
 0xd1d   :  { %v1489_v32 = vadd.f32 %v1488_v61, %v1461_v16 }
 0xd1f   :  { %v1492_v20 = vadd.f32 %v1489_v32, %v1403_v29 }
 0xd21   :  { %v1496_v3 = vsel %vm141_vm1, %v1492_v20, 0.0 }
 0xd22   :  { %1497 = vadd.xlane.f32.xlu1 %v1496_v3 }
 0xd8d   :  { %v1495_v45 = vpop.xlane.xlu0 %1494 }
 0xd8e   :  { %v1499_v22 = vmul.f32 %v1495_v45, %v2246_v7 }
 0xd90   :  { %v1501_v46 = vsub.f32 %v1491_v19, %v1499_v22 }
 0xd92   :  { %v1503_v11 = vmul.f32 %v1501_v46, %v1501_v46 }
 0xd94   :  { %v1505_v52 = vsel %vm141_vm1, %v1503_v11, 0.0 }
 0xd95   :  { %v1498_v26 = vpop.xlane.xlu1 %1497  ;;  %1506 = vadd.xlane.f32.xlu2 %v1505_v52 }
 0xd96   :  { %v1500_v50 = vmul.f32 %v1498_v26, %v2246_v7 }
 0xd98   :  { %v1502_v28 = vsub.f32 %v1492_v20, %v1500_v50 }
 0xd9a   :  { %v1504_v25 = vmul.f32 %v1502_v28, %v1502_v28 }
 0xd9c   :  { %v1508_v9 = vsel %vm141_vm1, %v1504_v25, 0.0 }
 0xd9d   :  { %1509 = vadd.xlane.f32.xlu1 %v1508_v9 }
 0xe08   :  { %v1507_v36 = vpop.xlane.xlu2 %1506 }
 0xe09   :  { %v1511_v27 = vmul.f32 %v1507_v36, %v2246_v7 }
 0xe0b   :  { %v1513_v30 = vadd.f32 1e-05, %v1511_v27 }
 0xe0d   :  { %1858 = vrsqrt.f32 %v1513_v30  ;;  %vm1521_vm9 = vweird.f32 %v1513_v30 }
 0xe10   :  { %v1510_v59 = vpop.xlane.xlu1 %1509 }
 0xe11   :  { %v1512_v35 = vmul.f32 %v1510_v59, %v2246_v7  ;;  %v1537_v7 = vperm.slane %v2334_v21, 6 }
 0xe13   :  { %v1859_v0 = vpop.eup %1858  ;;  %v1514_v41 = vadd.f32 1e-05, %v1512_v35 }
 0xe14   :  { %v1516_v44 = vmul.f32 %v1859_v0, %v1513_v30  ;;  %vm1522_vm8 = vweird.f32 %v1859_v0 }
 0xe15   :  { %1860 = vrsqrt.f32 %v1514_v41  ;;  %vm1523_vm12 = vmor %vm1521_vm9, %vm1522_vm8  ;;  %vm1531_vm7 = vweird.f32 %v1514_v41 }
 0xe16   :  { %v1517_v47 = vmul.f32 %v1859_v0, %v1516_v44  ;;  %1862 = vrcp.f32 %v1895_v56 }
 0xe18   :  { %v1518_v5 = vmul.f32 0.5, %v1517_v47 }
 0xe1a   :  { %v1519_v42 = vsub.f32 1.5, %v1518_v5 }
 0xe1b   :  { %v1861_v48 = vpop.eup %1860 }
 0xe1c   :  { %v1520_v51 = vmul.f32 %v1859_v0, %v1519_v42  ;;  %v1526_v10 = vmul.f32 %v1861_v48, %v1514_v41  ;;  %vm1532_vm6 = vweird.f32 %v1861_v48  ;;  %v1863_v38 = vpop.eup %1862 }
 0xe1d   :  { %vm1533_vm10 = vmor %vm1531_vm7, %vm1532_vm6  ;;  %v1558_v4 = vmul.f32 8.0, %v1863_v38  ;;  %vm1562_vm13 = vweird.f32 %v1863_v38 }
 0xe1e   :  { %v1524_v53 = vsel %vm1523_vm12, %v1859_v0, %v1520_v51  ;;  %v1527_v54 = vmul.f32 %v1861_v48, %v1526_v10 }
 0xe1f   :  { %v1535_v57 = vmul.f32 %v1524_v53, %v1501_v46  ;;  %v1559_v8 = vsub.f32 1.0, %v1558_v4  ;;  %v1771_v46 = vld [vmem:[%s2514_s7 + $0x20] ss:$0 sm:$0xff] }
 0xe20   :  { %v1528_v60 = vmul.f32 0.5, %v1527_v54 }
 0xe21   :  { %v1538_v62 = vmul.f32 %v1537_v7, %v1535_v57  ;;  %v1560_v14 = vmul.f32 %v1863_v38, %v1559_v8 }
 0xe22   :  { %v1529_v23 = vsub.f32 1.5, %v1528_v60 }
 0xe23   :  { %v1541_v18 = vadd.f32 %v1540_v17, %v1538_v62  ;;  %v1561_v24 = vadd.f32 %v1863_v38, %v1560_v14 }
 0xe24   :  { %v1530_v40 = vmul.f32 %v1861_v48, %v1529_v23 }
 0xe25   :  { %v1543_v63 = vsel %vm141_vm1, %v1541_v18, 0.0  ;;  %v1563_v32 = vsel %vm1562_vm13, %v1863_v38, %v1561_v24 }
 0xe26   :  { %v1544_v1 = vrot.slane %v1543_v63, 4  ;;  %v1534_v2 = vsel %vm1533_vm10, %v1861_v48, %v1530_v40 }
 0xe27   :  { %v1536_v29 = vmul.f32 %v1534_v2, %v1502_v28 }
 0xe28   :  { %v1545_v13 = vadd.f32 %v1544_v1, %v1543_v63 }
 0xe29   :  { %v1539_v6 = vmul.f32 %v1537_v7, %v1536_v29 }
 0xe2a   :  { %v1546_v43 = vrot.slane %v1545_v13, 2 }
 0xe2b   :  { %v1542_v21 = vadd.f32 %v1540_v17, %v1539_v6 }
 0xe2c   :  { %v1547_v49 = vadd.f32 %v1546_v43, %v1545_v13 }
 0xe2d   :  { %v1550_v15 = vsel %vm141_vm1, %v1542_v21, 0.0 }
 0xe2e   :  { %v1551_v12 = vrot.slane %v1550_v15, 4  ;;  %v1548_v16 = vrot.slane %v1547_v49, 1 }
 0xe30   :  { %v1552_v31 = vadd.f32 %v1551_v12, %v1550_v15  ;;  %v1549_v58 = vadd.f32 %v1548_v16, %v1547_v49 }
 0xe32   :  { %v1553_v55 = vrot.slane %v1552_v31, 2  ;;  %v1564_v3 = vmul.f32 %v1563_v32, %v1549_v58 }
 0xe34   :  { %v1554_v19 = vadd.f32 %v1553_v55, %v1552_v31 }
 0xe36   :  { %v1555_v61 = vrot.slane %v1554_v19, 1 }
 0xe38   :  { %v1556_v20 = vadd.f32 %v1555_v61, %v1554_v19 }
 0xe3a   :  { %v1565_v45 = vmul.f32 %v1563_v32, %v1556_v20 }
 0xe3c   :  { %v1575_v22 = vsel %vm1574_vm0, %v1565_v45, %v1564_v3 }
 0xe3d   :  { %1740 = vmatmul.msk.f32.vlgmr.msra.gmra.mxu2 %vm141_vm1, %v1575_v22 }
 0xec0   :  { %v1595_v11 = vpop.f32.mrf.mxu2 }
 0xec1   :  { %v1596_v52 = vadd.f32 %v1771_v46, %v1595_v11 }
 0xec3   :  { %1599 = vst.msk [vmem:[#allocation2] sm:$0x3] %vm1598_vm14, %v1596_v52 }
 0xec4   :  { %1610 = dma.vmem_to_hbm [thread:$0]  %s1606_s25, 32, %s1608_s26, [#allocation3]  }
 0xec5   :  { %1888 = dma.done.wait [#allocation3], 32  }
 0xec6   :  { %1889 = vsyncadd [#allocation3], 4294967264 }
 0xec7   :  { %1615 = vsyncpa [#allocation3], 1 }

</bundles_post_ra>
